<compile_context>
chip_gen: v6e
topology: v6e:2x2x1
jax: 0.10.0
libtpu: 0.0.40
codegen_flags: <defaults>
</compile_context>

<pallas_src>
import jax
import jax.numpy as jnp
from jax import lax
from jax.experimental import pallas as pl
from jax.experimental.pallas import tpu as pltpu

# ---------------- model dims ----------------
VOCAB = 50
PAD_IDX = 0
D_IN = 16        # config.input_dim (embedding dim)
H = 32           # config.d_model (hidden size)
HP = 128         # hidden padded so each gate occupies its own 128-lane (vreg) block
NUM_OUT = 4      # config.num_output
OUT_PAD = 128    # lane-dense output store; sliced back to NUM_OUT in glue
B = 2            # batch
BP = 8           # batch padded to a full sublane tile for the final (unmasked) store
T = 8            # seq len


def lstm_fc_kernel(tok_ref, table_ref, whh_ref, b_ref, wfc_ref, bfc_ref, out_ref):
    """Fused embedding-gather + input-projection, LSTM recurrence, and linear head.

    tok_ref:   (T*B, 1)        time-major flattened token ids (row t*B + b), int32
    table_ref: (VOCAB, 4*HP)   bf16, emb @ W_ih^T folded on host; gate k in cols [k*HP, k*HP+H)
    whh_ref:   (HP, 4*HP)      bf16, W_hh^T; rows >= H and padded gate columns are zero
    b_ref:     (1, 4*HP)       f32, b_ih + b_hh, padded lanes zero
    wfc_ref:   (HP, OUT_PAD)   bf16, fc.weight^T zero-padded
    bfc_ref:   (1, OUT_PAD)    f32, fc.bias zero-padded
    out_ref:   (BP, OUT_PAD)   f32, padded logits (first B rows / NUM_OUT lanes valid)
    """
    n_tok = tok_ref.shape[0]          # T * B
    vocab = table_ref.shape[0]
    hp = whh_ref.shape[0]

    # --- embedding gather + input projection fused into ONE MXU matmul (+ bias, once) ---
    # NOTE: token ids outside [0, VOCAB) map to an all-zero row instead of failing like
    # nn.Embedding; benign for valid inputs.
    tok = tok_ref[...]                                                       # (T*B, 1) int32
    onehot = (tok == lax.broadcasted_iota(jnp.int32, (n_tok, vocab), 1)
              ).astype(jnp.bfloat16)                                         # (T*B, VOCAB)
    xp = (jnp.dot(onehot, table_ref[...], preferred_element_type=jnp.float32)
          + b_ref[...])                                                      # (T*B, 4*HP) f32
    # xp is ~8 vregs; it stays in registers across the fully unrolled loop (no VMEM scratch).

    h = jnp.zeros((B, hp), jnp.float32)
    c = jnp.zeros((B, hp), jnp.float32)

    # Fixed T=8: fully unrolled Python loop with static slices of xp, so the LLO scheduler can
    # hoist every x_t extraction off the serial h/c dependency chain.
    for t in range(T):
        x_t = xp[t * B:(t + 1) * B, :]                                       # (B, 4*HP) static
        gates = x_t + jnp.dot(h.astype(jnp.bfloat16), whh_ref[...],
                              preferred_element_type=jnp.float32)            # (B, 4*HP) f32
        # PyTorch LSTM gate order: input, forget, cell(g), output.
        # Each gate is a whole aligned 128-lane block -> no XLU rotates on the serial chain.
        i_g = jax.nn.sigmoid(gates[:, 0 * hp:1 * hp])
        f_g = jax.nn.sigmoid(gates[:, 1 * hp:2 * hp])
        g_g = jnp.tanh(gates[:, 2 * hp:3 * hp])
        o_g = jax.nn.sigmoid(gates[:, 3 * hp:4 * hp])
        c = f_g * c + i_g * g_g
        h = o_g * jnp.tanh(c)

    # dropout is identity at inference. Pad batch rows to a full (8, 128) tile so the final
    # store is a dense, unmasked vst; padded rows are sliced away in the JAX glue.
    h_pad = jnp.concatenate([h, jnp.zeros((BP - B, hp), jnp.float32)], axis=0)
    out_ref[...] = (jnp.dot(h_pad.astype(jnp.bfloat16), wfc_ref[...],
                            preferred_element_type=jnp.float32) + bfc_ref[...])


def _pack_gate_cols(w, rows_pad=None):
    """w: (4*H, in_dim) PyTorch layout -> (in_dim [padded to rows_pad], 4*HP) with gate k
    occupying columns [k*HP, k*HP + H) and zeros elsewhere."""
    wt = w.T                                                   # (in_dim, 4*H)
    blocks = [jnp.pad(wt[:, k * H:(k + 1) * H], ((0, 0), (0, HP - H))) for k in range(4)]
    packed = jnp.concatenate(blocks, axis=1)                   # (in_dim, 4*HP)
    if rows_pad is not None and rows_pad > packed.shape[0]:
        packed = jnp.pad(packed, ((0, rows_pad - packed.shape[0]), (0, 0)))
    return packed.astype(jnp.float32)


def _pack_gate_bias(b):
    blocks = [jnp.pad(b[k * H:(k + 1) * H], (0, HP - H)) for k in range(4)]
    return jnp.concatenate(blocks).reshape(1, 4 * HP).astype(jnp.float32)


def rnn_model_forward(tokens, params):
    """tokens: (B, T) int32 -> logits (B, NUM_OUT) float32."""
    emb = params["embedding"].astype(jnp.float32)              # (VOCAB, D_IN)

    # Fold the embedding into W_ih on the host (pure weight preprocessing, const-folded):
    # table[v, :] = emb[v] @ W_ih^T  in the packed gate-column layout.
    wih_packed = _pack_gate_cols(params["w_ih"])                # (D_IN, 4*HP) f32
    table = (emb @ wih_packed).astype(jnp.bfloat16)             # (VOCAB, 4*HP) bf16

    whh_p = _pack_gate_cols(params["w_hh"], rows_pad=HP).astype(jnp.bfloat16)   # (HP, 4*HP)
    b_p = _pack_gate_bias(params["b_ih"] + params["b_hh"])                      # (1, 4*HP) f32
    wfc_p = (jnp.zeros((HP, OUT_PAD), jnp.float32)
             .at[:H, :NUM_OUT].set(params["w_fc"].T).astype(jnp.bfloat16))      # (HP, OUT_PAD)
    bfc_p = jnp.zeros((1, OUT_PAD), jnp.float32).at[0, :NUM_OUT].set(params["b_fc"])

    # time-major flattened token ids: row t*B + b  <->  (t, b)
    tok_tm = tokens.T.reshape(T * B, 1).astype(jnp.int32)

    vmem = pl.BlockSpec(memory_space=pltpu.MemorySpace.VMEM)

    out_pad = pl.pallas_call(
        lstm_fc_kernel,
        out_shape=jax.ShapeDtypeStruct((BP, OUT_PAD), jnp.float32),
        in_specs=[vmem] * 6,
        out_specs=vmem,
    )(tok_tm, table, whh_p, b_p, wfc_p, bfc_p)
    # TODO(synk): for large batches add a batch grid axis with
    # compiler_params=pltpu.CompilerParams(dimension_semantics=("parallel",)) so v7x's two
    # TensorCores split the batch, and size blocks against 64 MiB VMEM (v7x); pointless at B=2.
    return out_pad[:B, :NUM_OUT]


def init_params(key):
    k = jax.random.split(key, 7)
    emb = 0.1 * jax.random.normal(k[0], (VOCAB, D_IN), jnp.float32)
    emb = emb.at[PAD_IDX].set(0.0)  # nn.Embedding padding_idx row is zero
    params = {
        "embedding": emb,
        "w_ih": 0.1 * jax.random.normal(k[1], (4 * H, D_IN), jnp.float32),
        "w_hh": 0.1 * jax.random.normal(k[2], (4 * H, H), jnp.float32),
        "b_ih": 0.1 * jax.random.normal(k[3], (4 * H,), jnp.float32),
        "b_hh": 0.1 * jax.random.normal(k[4], (4 * H,), jnp.float32),
        "w_fc": 0.1 * jax.random.normal(k[5], (NUM_OUT, H), jnp.float32),
        "b_fc": 0.1 * jax.random.normal(k[6], (NUM_OUT,), jnp.float32),
    }
    return params


def reference_forward(tokens, params):
    """Pure-JAX f32 reference of the same forward pass (for a sanity check)."""
    x = jnp.take(params["embedding"], tokens, axis=0)  # (B, T, D_IN)
    h = jnp.zeros((B, H), jnp.float32)
    c = jnp.zeros((B, H), jnp.float32)
    wih_t = params["w_ih"].T
    whh_t = params["w_hh"].T
    bias = params["b_ih"] + params["b_hh"]
    for t in range(T):
        gates = x[:, t, :] @ wih_t + h @ whh_t + bias
        i_g = jax.nn.sigmoid(gates[:, 0 * H:1 * H])
        f_g = jax.nn.sigmoid(gates[:, 1 * H:2 * H])
        g_g = jnp.tanh(gates[:, 2 * H:3 * H])
        o_g = jax.nn.sigmoid(gates[:, 3 * H:4 * H])
        c = f_g * c + i_g * g_g
        h = o_g * jnp.tanh(c)
    return h @ params["w_fc"].T + params["b_fc"]


if __name__ == "__main__":
    key = jax.random.PRNGKey(0)
    params = init_params(key)
    tok_key = jax.random.fold_in(key, 123)
    tokens = jax.random.randint(tok_key, (B, T), 0, VOCAB, dtype=jnp.int32)

    logits = rnn_model_forward(tokens, params)
    logits = jax.block_until_ready(logits)

    ref = jax.block_until_ready(reference_forward(tokens, params))
    assert logits.shape == (B, NUM_OUT)
    # bf16 MXU operands (f32 accumulation) vs. pure-f32 reference -> loosened tolerance.
    assert jnp.allclose(logits, ref, atol=2e-2, rtol=2e-2), "mismatch vs JAX reference"

    # TODO(synk): CrossEntropyLoss / label_smoothing branch (labels is not None) not implemented;
    # only the logits path of forward() is reproduced (dropout is identity at eval).
    print("KERNEL_OK")
</pallas_src>

<mosaic_0001>
module attributes {stable_mosaic.version = 11 : i64} {
  func.func @lstm_fc_kernel(%arg0: memref<16x1xi32, #tpu.memory_space<vmem>>, %arg1: memref<50x512xbf16, #tpu.memory_space<vmem>>, %arg2: memref<128x512xbf16, #tpu.memory_space<vmem>>, %arg3: memref<1x512xf32, #tpu.memory_space<vmem>>, %arg4: memref<128x128xbf16, #tpu.memory_space<vmem>>, %arg5: memref<1x128xf32, #tpu.memory_space<vmem>>, %arg6: memref<8x128xf32, #tpu.memory_space<vmem>>) attributes {dimension_semantics = [], scalar_prefetch = 0 : i64, scratch_operands = 0 : i64, tpu.core_type = #tpu.core_type<tc>} {
    %c0 = arith.constant 0 : index
    %c0_0 = arith.constant 0 : index
    %0 = vector.load %arg0[%c0, %c0_0] : memref<16x1xi32, #tpu.memory_space<vmem>>, vector<16x1xi32>
    %1 = tpu.iota {dimensions = array<i32: 1>} : vector<16x50xi32>
    %2 = vector.broadcast %0 : vector<16x1xi32> to vector<16x50xi32>
    %3 = arith.cmpi eq, %2, %1 : vector<16x50xi32>
    %4 = arith.extui %3 : vector<16x50xi1> to vector<16x50xi32>
    %5 = arith.sitofp %4 : vector<16x50xi32> to vector<16x50xf32>
    %6 = arith.truncf %5 : vector<16x50xf32> to vector<16x50xbf16>
    %c0_1 = arith.constant 0 : index
    %c0_2 = arith.constant 0 : index
    %7 = vector.load %arg1[%c0_1, %c0_2] : memref<50x512xbf16, #tpu.memory_space<vmem>>, vector<50x512xbf16>
    %cst = arith.constant dense<0.000000e+00> : vector<16x512xf32>
    %8 = tpu.matmul %6, %7, %cst {dimension_numbers = #tpu.dot_dimension_numbers<[1], [0], [0], [1], [0, 0, 1, 1], [], []>} : vector<16x50xbf16>, vector<50x512xbf16>, vector<16x512xf32> -> vector<16x512xf32>
    %c0_3 = arith.constant 0 : index
    %c0_4 = arith.constant 0 : index
    %9 = vector.load %arg3[%c0_3, %c0_4] : memref<1x512xf32, #tpu.memory_space<vmem>>, vector<1x512xf32>
    %10 = vector.broadcast %9 : vector<1x512xf32> to vector<16x512xf32>
    %11 = arith.addf %8, %10 : vector<16x512xf32>
    %cst_5 = arith.constant 0.000000e+00 : f32
    %12 = vector.broadcast %cst_5 : f32 to vector<2x128xf32>
    %cst_6 = arith.constant 0.000000e+00 : f32
    %13 = vector.broadcast %cst_6 : f32 to vector<2x128xf32>
    %14 = vector.extract_strided_slice %11 {offsets = [0, 0], sizes = [2, 512], strides = [1, 1]} : vector<16x512xf32> to vector<2x512xf32>
    %15 = arith.truncf %12 : vector<2x128xf32> to vector<2x128xbf16>
    %c0_7 = arith.constant 0 : index
    %c0_8 = arith.constant 0 : index
    %16 = vector.load %arg2[%c0_7, %c0_8] : memref<128x512xbf16, #tpu.memory_space<vmem>>, vector<128x512xbf16>
    %cst_9 = arith.constant dense<0.000000e+00> : vector<2x512xf32>
    %17 = tpu.matmul %15, %16, %cst_9 {dimension_numbers = #tpu.dot_dimension_numbers<[1], [0], [0], [1], [0, 0, 1, 1], [], []>} : vector<2x128xbf16>, vector<128x512xbf16>, vector<2x512xf32> -> vector<2x512xf32>
    %18 = arith.addf %14, %17 : vector<2x512xf32>
    %19 = vector.extract_strided_slice %18 {offsets = [0, 0], sizes = [2, 128], strides = [1, 1]} : vector<2x512xf32> to vector<2x128xf32>
    %20 = arith.negf %19 : vector<2x128xf32>
    %21 = math.exp %20 : vector<2x128xf32>
    %cst_10 = arith.constant 1.000000e+00 : f32
    %22 = vector.broadcast %cst_10 : f32 to vector<2x128xf32>
    %23 = arith.addf %22, %21 : vector<2x128xf32>
    %24 = arith.divf %22, %23 : vector<2x128xf32>
    %25 = vector.extract_strided_slice %18 {offsets = [0, 128], sizes = [2, 128], strides = [1, 1]} : vector<2x512xf32> to vector<2x128xf32>
    %26 = arith.negf %25 : vector<2x128xf32>
    %27 = math.exp %26 : vector<2x128xf32>
    %cst_11 = arith.constant 1.000000e+00 : f32
    %28 = vector.broadcast %cst_11 : f32 to vector<2x128xf32>
    %29 = arith.addf %28, %27 : vector<2x128xf32>
    %30 = arith.divf %28, %29 : vector<2x128xf32>
    %31 = vector.extract_strided_slice %18 {offsets = [0, 256], sizes = [2, 128], strides = [1, 1]} : vector<2x512xf32> to vector<2x128xf32>
    %32 = math.tanh %31 : vector<2x128xf32>
    %33 = vector.extract_strided_slice %18 {offsets = [0, 384], sizes = [2, 128], strides = [1, 1]} : vector<2x512xf32> to vector<2x128xf32>
    %34 = arith.negf %33 : vector<2x128xf32>
    %35 = math.exp %34 : vector<2x128xf32>
    %cst_12 = arith.constant 1.000000e+00 : f32
    %36 = vector.broadcast %cst_12 : f32 to vector<2x128xf32>
    %37 = arith.addf %36, %35 : vector<2x128xf32>
    %38 = arith.divf %36, %37 : vector<2x128xf32>
    %39 = arith.mulf %30, %13 : vector<2x128xf32>
    %40 = arith.mulf %24, %32 : vector<2x128xf32>
    %41 = arith.addf %39, %40 : vector<2x128xf32>
    %42 = math.tanh %41 : vector<2x128xf32>
    %43 = arith.mulf %38, %42 : vector<2x128xf32>
    %44 = vector.extract_strided_slice %11 {offsets = [2, 0], sizes = [2, 512], strides = [1, 1]} : vector<16x512xf32> to vector<2x512xf32>
    %45 = arith.truncf %43 : vector<2x128xf32> to vector<2x128xbf16>
    %c0_13 = arith.constant 0 : index
    %c0_14 = arith.constant 0 : index
    %46 = vector.load %arg2[%c0_13, %c0_14] : memref<128x512xbf16, #tpu.memory_space<vmem>>, vector<128x512xbf16>
    %cst_15 = arith.constant dense<0.000000e+00> : vector<2x512xf32>
    %47 = tpu.matmul %45, %46, %cst_15 {dimension_numbers = #tpu.dot_dimension_numbers<[1], [0], [0], [1], [0, 0, 1, 1], [], []>} : vector<2x128xbf16>, vector<128x512xbf16>, vector<2x512xf32> -> vector<2x512xf32>
    %48 = arith.addf %44, %47 : vector<2x512xf32>
    %49 = vector.extract_strided_slice %48 {offsets = [0, 0], sizes = [2, 128], strides = [1, 1]} : vector<2x512xf32> to vector<2x128xf32>
    %50 = arith.negf %49 : vector<2x128xf32>
    %51 = math.exp %50 : vector<2x128xf32>
    %cst_16 = arith.constant 1.000000e+00 : f32
    %52 = vector.broadcast %cst_16 : f32 to vector<2x128xf32>
    %53 = arith.addf %52, %51 : vector<2x128xf32>
    %54 = arith.divf %52, %53 : vector<2x128xf32>
    %55 = vector.extract_strided_slice %48 {offsets = [0, 128], sizes = [2, 128], strides = [1, 1]} : vector<2x512xf32> to vector<2x128xf32>
    %56 = arith.negf %55 : vector<2x128xf32>
    %57 = math.exp %56 : vector<2x128xf32>
    %cst_17 = arith.constant 1.000000e+00 : f32
    %58 = vector.broadcast %cst_17 : f32 to vector<2x128xf32>
    %59 = arith.addf %58, %57 : vector<2x128xf32>
    %60 = arith.divf %58, %59 : vector<2x128xf32>
    %61 = vector.extract_strided_slice %48 {offsets = [0, 256], sizes = [2, 128], strides = [1, 1]} : vector<2x512xf32> to vector<2x128xf32>
    %62 = math.tanh %61 : vector<2x128xf32>
    %63 = vector.extract_strided_slice %48 {offsets = [0, 384], sizes = [2, 128], strides = [1, 1]} : vector<2x512xf32> to vector<2x128xf32>
    %64 = arith.negf %63 : vector<2x128xf32>
    %65 = math.exp %64 : vector<2x128xf32>
    %cst_18 = arith.constant 1.000000e+00 : f32
    %66 = vector.broadcast %cst_18 : f32 to vector<2x128xf32>
    %67 = arith.addf %66, %65 : vector<2x128xf32>
    %68 = arith.divf %66, %67 : vector<2x128xf32>
    %69 = arith.mulf %60, %41 : vector<2x128xf32>
    %70 = arith.mulf %54, %62 : vector<2x128xf32>
    %71 = arith.addf %69, %70 : vector<2x128xf32>
    %72 = math.tanh %71 : vector<2x128xf32>
    %73 = arith.mulf %68, %72 : vector<2x128xf32>
    %74 = vector.extract_strided_slice %11 {offsets = [4, 0], sizes = [2, 512], strides = [1, 1]} : vector<16x512xf32> to vector<2x512xf32>
    %75 = arith.truncf %73 : vector<2x128xf32> to vector<2x128xbf16>
    %c0_19 = arith.constant 0 : index
    %c0_20 = arith.constant 0 : index
    %76 = vector.load %arg2[%c0_19, %c0_20] : memref<128x512xbf16, #tpu.memory_space<vmem>>, vector<128x512xbf16>
    %cst_21 = arith.constant dense<0.000000e+00> : vector<2x512xf32>
    %77 = tpu.matmul %75, %76, %cst_21 {dimension_numbers = #tpu.dot_dimension_numbers<[1], [0], [0], [1], [0, 0, 1, 1], [], []>} : vector<2x128xbf16>, vector<128x512xbf16>, vector<2x512xf32> -> vector<2x512xf32>
    %78 = arith.addf %74, %77 : vector<2x512xf32>
    %79 = vector.extract_strided_slice %78 {offsets = [0, 0], sizes = [2, 128], strides = [1, 1]} : vector<2x512xf32> to vector<2x128xf32>
    %80 = arith.negf %79 : vector<2x128xf32>
    %81 = math.exp %80 : vector<2x128xf32>
    %cst_22 = arith.constant 1.000000e+00 : f32
    %82 = vector.broadcast %cst_22 : f32 to vector<2x128xf32>
    %83 = arith.addf %82, %81 : vector<2x128xf32>
    %84 = arith.divf %82, %83 : vector<2x128xf32>
    %85 = vector.extract_strided_slice %78 {offsets = [0, 128], sizes = [2, 128], strides = [1, 1]} : vector<2x512xf32> to vector<2x128xf32>
    %86 = arith.negf %85 : vector<2x128xf32>
    %87 = math.exp %86 : vector<2x128xf32>
    %cst_23 = arith.constant 1.000000e+00 : f32
    %88 = vector.broadcast %cst_23 : f32 to vector<2x128xf32>
    %89 = arith.addf %88, %87 : vector<2x128xf32>
    %90 = arith.divf %88, %89 : vector<2x128xf32>
    %91 = vector.extract_strided_slice %78 {offsets = [0, 256], sizes = [2, 128], strides = [1, 1]} : vector<2x512xf32> to vector<2x128xf32>
    %92 = math.tanh %91 : vector<2x128xf32>
    %93 = vector.extract_strided_slice %78 {offsets = [0, 384], sizes = [2, 128], strides = [1, 1]} : vector<2x512xf32> to vector<2x128xf32>
    %94 = arith.negf %93 : vector<2x128xf32>
    %95 = math.exp %94 : vector<2x128xf32>
    %cst_24 = arith.constant 1.000000e+00 : f32
    %96 = vector.broadcast %cst_24 : f32 to vector<2x128xf32>
    %97 = arith.addf %96, %95 : vector<2x128xf32>
    %98 = arith.divf %96, %97 : vector<2x128xf32>
    %99 = arith.mulf %90, %71 : vector<2x128xf32>
    %100 = arith.mulf %84, %92 : vector<2x128xf32>
    %101 = arith.addf %99, %100 : vector<2x128xf32>
    %102 = math.tanh %101 : vector<2x128xf32>
    %103 = arith.mulf %98, %102 : vector<2x128xf32>
    %104 = vector.extract_strided_slice %11 {offsets = [6, 0], sizes = [2, 512], strides = [1, 1]} : vector<16x512xf32> to vector<2x512xf32>
    %105 = arith.truncf %103 : vector<2x128xf32> to vector<2x128xbf16>
    %c0_25 = arith.constant 0 : index
    %c0_26 = arith.constant 0 : index
    %106 = vector.load %arg2[%c0_25, %c0_26] : memref<128x512xbf16, #tpu.memory_space<vmem>>, vector<128x512xbf16>
    %cst_27 = arith.constant dense<0.000000e+00> : vector<2x512xf32>
    %107 = tpu.matmul %105, %106, %cst_27 {dimension_numbers = #tpu.dot_dimension_numbers<[1], [0], [0], [1], [0, 0, 1, 1], [], []>} : vector<2x128xbf16>, vector<128x512xbf16>, vector<2x512xf32> -> vector<2x512xf32>
    %108 = arith.addf %104, %107 : vector<2x512xf32>
    %109 = vector.extract_strided_slice %108 {offsets = [0, 0], sizes = [2, 128], strides = [1, 1]} : vector<2x512xf32> to vector<2x128xf32>
    %110 = arith.negf %109 : vector<2x128xf32>
    %111 = math.exp %110 : vector<2x128xf32>
    %cst_28 = arith.constant 1.000000e+00 : f32
    %112 = vector.broadcast %cst_28 : f32 to vector<2x128xf32>
    %113 = arith.addf %112, %111 : vector<2x128xf32>
    %114 = arith.divf %112, %113 : vector<2x128xf32>
    %115 = vector.extract_strided_slice %108 {offsets = [0, 128], sizes = [2, 128], strides = [1, 1]} : vector<2x512xf32> to vector<2x128xf32>
    %116 = arith.negf %115 : vector<2x128xf32>
    %117 = math.exp %116 : vector<2x128xf32>
    %cst_29 = arith.constant 1.000000e+00 : f32
    %118 = vector.broadcast %cst_29 : f32 to vector<2x128xf32>
    %119 = arith.addf %118, %117 : vector<2x128xf32>
    %120 = arith.divf %118, %119 : vector<2x128xf32>
    %121 = vector.extract_strided_slice %108 {offsets = [0, 256], sizes = [2, 128], strides = [1, 1]} : vector<2x512xf32> to vector<2x128xf32>
    %122 = math.tanh %121 : vector<2x128xf32>
    %123 = vector.extract_strided_slice %108 {offsets = [0, 384], sizes = [2, 128], strides = [1, 1]} : vector<2x512xf32> to vector<2x128xf32>
    %124 = arith.negf %123 : vector<2x128xf32>
    %125 = math.exp %124 : vector<2x128xf32>
    %cst_30 = arith.constant 1.000000e+00 : f32
    %126 = vector.broadcast %cst_30 : f32 to vector<2x128xf32>
    %127 = arith.addf %126, %125 : vector<2x128xf32>
    %128 = arith.divf %126, %127 : vector<2x128xf32>
    %129 = arith.mulf %120, %101 : vector<2x128xf32>
    %130 = arith.mulf %114, %122 : vector<2x128xf32>
    %131 = arith.addf %129, %130 : vector<2x128xf32>
    %132 = math.tanh %131 : vector<2x128xf32>
    %133 = arith.mulf %128, %132 : vector<2x128xf32>
    %134 = vector.extract_strided_slice %11 {offsets = [8, 0], sizes = [2, 512], strides = [1, 1]} : vector<16x512xf32> to vector<2x512xf32>
    %135 = arith.truncf %133 : vector<2x128xf32> to vector<2x128xbf16>
    %c0_31 = arith.constant 0 : index
    %c0_32 = arith.constant 0 : index
    %136 = vector.load %arg2[%c0_31, %c0_32] : memref<128x512xbf16, #tpu.memory_space<vmem>>, vector<128x512xbf16>
    %cst_33 = arith.constant dense<0.000000e+00> : vector<2x512xf32>
    %137 = tpu.matmul %135, %136, %cst_33 {dimension_numbers = #tpu.dot_dimension_numbers<[1], [0], [0], [1], [0, 0, 1, 1], [], []>} : vector<2x128xbf16>, vector<128x512xbf16>, vector<2x512xf32> -> vector<2x512xf32>
    %138 = arith.addf %134, %137 : vector<2x512xf32>
    %139 = vector.extract_strided_slice %138 {offsets = [0, 0], sizes = [2, 128], strides = [1, 1]} : vector<2x512xf32> to vector<2x128xf32>
    %140 = arith.negf %139 : vector<2x128xf32>
    %141 = math.exp %140 : vector<2x128xf32>
    %cst_34 = arith.constant 1.000000e+00 : f32
    %142 = vector.broadcast %cst_34 : f32 to vector<2x128xf32>
    %143 = arith.addf %142, %141 : vector<2x128xf32>
    %144 = arith.divf %142, %143 : vector<2x128xf32>
    %145 = vector.extract_strided_slice %138 {offsets = [0, 128], sizes = [2, 128], strides = [1, 1]} : vector<2x512xf32> to vector<2x128xf32>
    %146 = arith.negf %145 : vector<2x128xf32>
    %147 = math.exp %146 : vector<2x128xf32>
    %cst_35 = arith.constant 1.000000e+00 : f32
    %148 = vector.broadcast %cst_35 : f32 to vector<2x128xf32>
    %149 = arith.addf %148, %147 : vector<2x128xf32>
    %150 = arith.divf %148, %149 : vector<2x128xf32>
    %151 = vector.extract_strided_slice %138 {offsets = [0, 256], sizes = [2, 128], strides = [1, 1]} : vector<2x512xf32> to vector<2x128xf32>
    %152 = math.tanh %151 : vector<2x128xf32>
    %153 = vector.extract_strided_slice %138 {offsets = [0, 384], sizes = [2, 128], strides = [1, 1]} : vector<2x512xf32> to vector<2x128xf32>
    %154 = arith.negf %153 : vector<2x128xf32>
    %155 = math.exp %154 : vector<2x128xf32>
    %cst_36 = arith.constant 1.000000e+00 : f32
    %156 = vector.broadcast %cst_36 : f32 to vector<2x128xf32>
    %157 = arith.addf %156, %155 : vector<2x128xf32>
    %158 = arith.divf %156, %157 : vector<2x128xf32>
    %159 = arith.mulf %150, %131 : vector<2x128xf32>
    %160 = arith.mulf %144, %152 : vector<2x128xf32>
    %161 = arith.addf %159, %160 : vector<2x128xf32>
    %162 = math.tanh %161 : vector<2x128xf32>
    %163 = arith.mulf %158, %162 : vector<2x128xf32>
    %164 = vector.extract_strided_slice %11 {offsets = [10, 0], sizes = [2, 512], strides = [1, 1]} : vector<16x512xf32> to vector<2x512xf32>
    %165 = arith.truncf %163 : vector<2x128xf32> to vector<2x128xbf16>
    %c0_37 = arith.constant 0 : index
    %c0_38 = arith.constant 0 : index
    %166 = vector.load %arg2[%c0_37, %c0_38] : memref<128x512xbf16, #tpu.memory_space<vmem>>, vector<128x512xbf16>
    %cst_39 = arith.constant dense<0.000000e+00> : vector<2x512xf32>
    %167 = tpu.matmul %165, %166, %cst_39 {dimension_numbers = #tpu.dot_dimension_numbers<[1], [0], [0], [1], [0, 0, 1, 1], [], []>} : vector<2x128xbf16>, vector<128x512xbf16>, vector<2x512xf32> -> vector<2x512xf32>
    %168 = arith.addf %164, %167 : vector<2x512xf32>
    %169 = vector.extract_strided_slice %168 {offsets = [0, 0], sizes = [2, 128], strides = [1, 1]} : vector<2x512xf32> to vector<2x128xf32>
    %170 = arith.negf %169 : vector<2x128xf32>
    %171 = math.exp %170 : vector<2x128xf32>
    %cst_40 = arith.constant 1.000000e+00 : f32
    %172 = vector.broadcast %cst_40 : f32 to vector<2x128xf32>
    %173 = arith.addf %172, %171 : vector<2x128xf32>
    %174 = arith.divf %172, %173 : vector<2x128xf32>
    %175 = vector.extract_strided_slice %168 {offsets = [0, 128], sizes = [2, 128], strides = [1, 1]} : vector<2x512xf32> to vector<2x128xf32>
    %176 = arith.negf %175 : vector<2x128xf32>
    %177 = math.exp %176 : vector<2x128xf32>
    %cst_41 = arith.constant 1.000000e+00 : f32
    %178 = vector.broadcast %cst_41 : f32 to vector<2x128xf32>
    %179 = arith.addf %178, %177 : vector<2x128xf32>
    %180 = arith.divf %178, %179 : vector<2x128xf32>
    %181 = vector.extract_strided_slice %168 {offsets = [0, 256], sizes = [2, 128], strides = [1, 1]} : vector<2x512xf32> to vector<2x128xf32>
    %182 = math.tanh %181 : vector<2x128xf32>
    %183 = vector.extract_strided_slice %168 {offsets = [0, 384], sizes = [2, 128], strides = [1, 1]} : vector<2x512xf32> to vector<2x128xf32>
    %184 = arith.negf %183 : vector<2x128xf32>
    %185 = math.exp %184 : vector<2x128xf32>
    %cst_42 = arith.constant 1.000000e+00 : f32
    %186 = vector.broadcast %cst_42 : f32 to vector<2x128xf32>
    %187 = arith.addf %186, %185 : vector<2x128xf32>
    %188 = arith.divf %186, %187 : vector<2x128xf32>
    %189 = arith.mulf %180, %161 : vector<2x128xf32>
    %190 = arith.mulf %174, %182 : vector<2x128xf32>
    %191 = arith.addf %189, %190 : vector<2x128xf32>
    %192 = math.tanh %191 : vector<2x128xf32>
    %193 = arith.mulf %188, %192 : vector<2x128xf32>
    %194 = vector.extract_strided_slice %11 {offsets = [12, 0], sizes = [2, 512], strides = [1, 1]} : vector<16x512xf32> to vector<2x512xf32>
    %195 = arith.truncf %193 : vector<2x128xf32> to vector<2x128xbf16>
    %c0_43 = arith.constant 0 : index
    %c0_44 = arith.constant 0 : index
    %196 = vector.load %arg2[%c0_43, %c0_44] : memref<128x512xbf16, #tpu.memory_space<vmem>>, vector<128x512xbf16>
    %cst_45 = arith.constant dense<0.000000e+00> : vector<2x512xf32>
    %197 = tpu.matmul %195, %196, %cst_45 {dimension_numbers = #tpu.dot_dimension_numbers<[1], [0], [0], [1], [0, 0, 1, 1], [], []>} : vector<2x128xbf16>, vector<128x512xbf16>, vector<2x512xf32> -> vector<2x512xf32>
    %198 = arith.addf %194, %197 : vector<2x512xf32>
    %199 = vector.extract_strided_slice %198 {offsets = [0, 0], sizes = [2, 128], strides = [1, 1]} : vector<2x512xf32> to vector<2x128xf32>
    %200 = arith.negf %199 : vector<2x128xf32>
    %201 = math.exp %200 : vector<2x128xf32>
    %cst_46 = arith.constant 1.000000e+00 : f32
    %202 = vector.broadcast %cst_46 : f32 to vector<2x128xf32>
    %203 = arith.addf %202, %201 : vector<2x128xf32>
    %204 = arith.divf %202, %203 : vector<2x128xf32>
    %205 = vector.extract_strided_slice %198 {offsets = [0, 128], sizes = [2, 128], strides = [1, 1]} : vector<2x512xf32> to vector<2x128xf32>
    %206 = arith.negf %205 : vector<2x128xf32>
    %207 = math.exp %206 : vector<2x128xf32>
    %cst_47 = arith.constant 1.000000e+00 : f32
    %208 = vector.broadcast %cst_47 : f32 to vector<2x128xf32>
    %209 = arith.addf %208, %207 : vector<2x128xf32>
    %210 = arith.divf %208, %209 : vector<2x128xf32>
    %211 = vector.extract_strided_slice %198 {offsets = [0, 256], sizes = [2, 128], strides = [1, 1]} : vector<2x512xf32> to vector<2x128xf32>
    %212 = math.tanh %211 : vector<2x128xf32>
    %213 = vector.extract_strided_slice %198 {offsets = [0, 384], sizes = [2, 128], strides = [1, 1]} : vector<2x512xf32> to vector<2x128xf32>
    %214 = arith.negf %213 : vector<2x128xf32>
    %215 = math.exp %214 : vector<2x128xf32>
    %cst_48 = arith.constant 1.000000e+00 : f32
    %216 = vector.broadcast %cst_48 : f32 to vector<2x128xf32>
    %217 = arith.addf %216, %215 : vector<2x128xf32>
    %218 = arith.divf %216, %217 : vector<2x128xf32>
    %219 = arith.mulf %210, %191 : vector<2x128xf32>
    %220 = arith.mulf %204, %212 : vector<2x128xf32>
    %221 = arith.addf %219, %220 : vector<2x128xf32>
    %222 = math.tanh %221 : vector<2x128xf32>
    %223 = arith.mulf %218, %222 : vector<2x128xf32>
    %224 = vector.extract_strided_slice %11 {offsets = [14, 0], sizes = [2, 512], strides = [1, 1]} : vector<16x512xf32> to vector<2x512xf32>
    %225 = arith.truncf %223 : vector<2x128xf32> to vector<2x128xbf16>
    %c0_49 = arith.constant 0 : index
    %c0_50 = arith.constant 0 : index
    %226 = vector.load %arg2[%c0_49, %c0_50] : memref<128x512xbf16, #tpu.memory_space<vmem>>, vector<128x512xbf16>
    %cst_51 = arith.constant dense<0.000000e+00> : vector<2x512xf32>
    %227 = tpu.matmul %225, %226, %cst_51 {dimension_numbers = #tpu.dot_dimension_numbers<[1], [0], [0], [1], [0, 0, 1, 1], [], []>} : vector<2x128xbf16>, vector<128x512xbf16>, vector<2x512xf32> -> vector<2x512xf32>
    %228 = arith.addf %224, %227 : vector<2x512xf32>
    %229 = vector.extract_strided_slice %228 {offsets = [0, 0], sizes = [2, 128], strides = [1, 1]} : vector<2x512xf32> to vector<2x128xf32>
    %230 = arith.negf %229 : vector<2x128xf32>
    %231 = math.exp %230 : vector<2x128xf32>
    %cst_52 = arith.constant 1.000000e+00 : f32
    %232 = vector.broadcast %cst_52 : f32 to vector<2x128xf32>
    %233 = arith.addf %232, %231 : vector<2x128xf32>
    %234 = arith.divf %232, %233 : vector<2x128xf32>
    %235 = vector.extract_strided_slice %228 {offsets = [0, 128], sizes = [2, 128], strides = [1, 1]} : vector<2x512xf32> to vector<2x128xf32>
    %236 = arith.negf %235 : vector<2x128xf32>
    %237 = math.exp %236 : vector<2x128xf32>
    %cst_53 = arith.constant 1.000000e+00 : f32
    %238 = vector.broadcast %cst_53 : f32 to vector<2x128xf32>
    %239 = arith.addf %238, %237 : vector<2x128xf32>
    %240 = arith.divf %238, %239 : vector<2x128xf32>
    %241 = vector.extract_strided_slice %228 {offsets = [0, 256], sizes = [2, 128], strides = [1, 1]} : vector<2x512xf32> to vector<2x128xf32>
    %242 = math.tanh %241 : vector<2x128xf32>
    %243 = vector.extract_strided_slice %228 {offsets = [0, 384], sizes = [2, 128], strides = [1, 1]} : vector<2x512xf32> to vector<2x128xf32>
    %244 = arith.negf %243 : vector<2x128xf32>
    %245 = math.exp %244 : vector<2x128xf32>
    %cst_54 = arith.constant 1.000000e+00 : f32
    %246 = vector.broadcast %cst_54 : f32 to vector<2x128xf32>
    %247 = arith.addf %246, %245 : vector<2x128xf32>
    %248 = arith.divf %246, %247 : vector<2x128xf32>
    %249 = arith.mulf %240, %221 : vector<2x128xf32>
    %250 = arith.mulf %234, %242 : vector<2x128xf32>
    %251 = arith.addf %249, %250 : vector<2x128xf32>
    %252 = math.tanh %251 : vector<2x128xf32>
    %253 = arith.mulf %248, %252 : vector<2x128xf32>
    %cst_55 = arith.constant 0.000000e+00 : f32
    %254 = vector.broadcast %cst_55 : f32 to vector<6x128xf32>
    %255 = tpu.concatenate %253, %254 in 0 : vector<2x128xf32>, vector<6x128xf32> -> vector<8x128xf32>
    %256 = arith.truncf %255 : vector<8x128xf32> to vector<8x128xbf16>
    %c0_56 = arith.constant 0 : index
    %c0_57 = arith.constant 0 : index
    %257 = vector.load %arg4[%c0_56, %c0_57] : memref<128x128xbf16, #tpu.memory_space<vmem>>, vector<128x128xbf16>
    %cst_58 = arith.constant dense<0.000000e+00> : vector<8x128xf32>
    %258 = tpu.matmul %256, %257, %cst_58 {dimension_numbers = #tpu.dot_dimension_numbers<[1], [0], [0], [1], [0, 0, 1, 1], [], []>} : vector<8x128xbf16>, vector<128x128xbf16>, vector<8x128xf32> -> vector<8x128xf32>
    %c0_59 = arith.constant 0 : index
    %c0_60 = arith.constant 0 : index
    %259 = vector.load %arg5[%c0_59, %c0_60] : memref<1x128xf32, #tpu.memory_space<vmem>>, vector<1x128xf32>
    %260 = vector.broadcast %259 : vector<1x128xf32> to vector<8x128xf32>
    %261 = arith.addf %258, %260 : vector<8x128xf32>
    %c0_61 = arith.constant 0 : index
    %c0_62 = arith.constant 0 : index
    %262 = vector.load %arg6[%c0_61, %c0_62] : memref<8x128xf32, #tpu.memory_space<vmem>>, vector<8x128xf32>
    tpu.vector_store %arg6[%c0_61, %c0_62], %261 {strides = array<i32>} : memref<8x128xf32, #tpu.memory_space<vmem>>, vector<8x128xf32>,
    return
  }
}

</mosaic_0001>

<bundles_post_ra>
// kernel: tpu_custom_call.1
= control target key start
LH: loop header
LB: loop body
LE: loop exit
PB: predicated region body
PF: predicated region fallthrough
CT: control target
= control target key end

     0   :  { %11 = vsyncpa [#allocation3], 0  ;;  %s2590_s0 = inlined_call_operand.vmem [shape: s32[16,1], index: 0, kind: input, shape index: {}]   ;;  %s2591_s1 = inlined_call_operand.hbm [shape: bf16[50,512], index: 1, kind: input, shape index: {}]   ;;  %s2592_s2 = inlined_call_operand.hbm [shape: bf16[128,512], index: 2, kind: input, shape index: {}]   ;;  %s2593_s3 = inlined_call_operand.vmem [shape: f32[1,512], index: 3, kind: input, shape index: {}]   ;;  %s2594_s4 = inlined_call_operand.hbm [shape: bf16[128,128], index: 4, kind: input, shape index: {}]   ;;  %s2595_s5 = inlined_call_operand.vmem [shape: f32[1,128], index: 5, kind: input, shape index: {}]   ;;  %s2596_s6 = inlined_call_operand.hbm [shape: f32[8,128], index: 6, kind: output, shape index: {}]  }
   0x1   :  { %12 = vsyncpa [#allocation6], 0 }
   0x2   :  { %13 = vsyncpa [#allocation4], 0  ;;  %s2067_s21 = smov [#allocation5]   ;;  %s2068_s23 = smov [#allocation2]  }
   0x3   :  { %s33_s22 = sshll.u32 %s2067_s21, 4  ;;  %s21_s24 = sshll.u32 %s2068_s23, 4  ;;  %s34_s22 = int_to_ptr.vmem [resolvable:$true] %s33_s22  ;;  %s22_s24 = int_to_ptr.vmem [resolvable:$true] %s21_s24 }
   0x4   :  { %s1989_s25 = scalar_lea.vmem %s34_s22, 4096  ;;  %p1994_p1 = scmp.lt.s32.totalorder %s34_s22, %s34_s22 }
   0x5   :  { %p1990_p0 = scmp.ne.s32.totalorder %s34_s22, %s1989_s25  ;;  %p1995_p2 = scmp.lt.s32.totalorder %s1989_s25, %s1989_s25 }
   0x7   :  { %p1996_p3 = por %p1995_p2, %p1994_p1 }
   0x9   :  { %p1997_p4 = pnand %p1996_p3, %p1990_p0 }
   0xb   :  { %2000 = shalt.err (!%p1997_p4)
}
   0xc   :  { %s2069_s26 = smov 256   ;;  %s2070_s27 = smov 16  }
   0xd   :  { %39 = dma.hbm_to_vmem [thread:$0]  %s2592_s2, 4096, %s34_s22, [#allocation6], %s2069_s26, %s2069_s26, %s2070_s27  }
   0xe   :  { %s2009_s30 = scalar_lea.vmem %s22_s24, 1792  ;;  %p2014_p6 = scmp.lt.s32.totalorder %s22_s24, %s22_s24 }
   0xf   :  { %p2010_p5 = scmp.ne.s32.totalorder %s22_s24, %s2009_s30  ;;  %p2015_p7 = scmp.lt.s32.totalorder %s2009_s30, %s2009_s30 }
  0x11   :  { %p2016_p8 = por %p2015_p7, %p2014_p6 }
  0x13   :  { %p2017_p9 = pnand %p2016_p8, %p2010_p5 }
  0x15   :  { %2020 = shalt.err (!%p2017_p9)
}
  0x16   :  { %27 = dma.hbm_to_vmem [thread:$0]  %s2591_s1, 1792, %s22_s24, [#allocation3], %s2069_s26, %s2069_s26, %s2070_s27  }
  0x17   :  { %s2071_s9 = smov [#allocation7]  }
  0x18   :  { %s47_s10 = sshll.u32 %s2071_s9, 4  ;;  %s48_s10 = int_to_ptr.vmem [resolvable:$true] %s47_s10 }
  0x19   :  { %s2029_s11 = scalar_lea.vmem %s48_s10, 1024  ;;  %p2034_p11 = scmp.lt.s32.totalorder %s48_s10, %s48_s10 }
  0x1a   :  { %p2030_p10 = scmp.ne.s32.totalorder %s48_s10, %s2029_s11  ;;  %p2035_p12 = scmp.lt.s32.totalorder %s2029_s11, %s2029_s11 }
  0x1c   :  { %p2036_p13 = por %p2035_p12, %p2034_p11 }
  0x1e   :  { %p2037_p0 = pnand %p2036_p13, %p2030_p10 }
  0x20   :  { %2040 = shalt.err (!%p2037_p0)
}
  0x21   :  { %s2072_s2 = smov 64   ;;  %s2073_s12 = smov 4  }
  0x22   :  { %53 = dma.hbm_to_vmem [thread:$0]  %s2594_s4, 1024, %s48_s10, [#allocation6], %s2072_s2, %s2072_s2, %s2073_s12  }
  0x23   :  { %2061 = dma.done.wait [#allocation3], 1792  }
  0x24   :  { %2062 = vsyncadd [#allocation3], 4294965504 }
  0x25   :  { %2063 = dma.done.wait [#allocation6], 5120  }
  0x26   :  { %2064 = vsyncadd [#allocation6], 4294962176  ;;  %v2074_v0 = vmov 0   ;;  %v66_v1 = vld [vmem:[%s2590_s0] sm:$0xff]  ;;  %v67_v2 = vld [vmem:[%s2590_s0 + $0x8] sm:$0xff]  ;;  %vm193_vm0 = vcmask 1040384   ;;  %v68_v33 = vlaneseq }
  0x27   :  { %1743 = vset.pattern.permute.xlu0 %v2074_v0  ;;  %238 = vmatprep.mubr.bf16.mxu1 %v2074_v0  ;;  %v2131_v3 = vld [vmem:[#allocation5 + $0xe4] ss:$16 sps:$4 sm:$0xff]   ;;  %v2133_v4 = vld [vmem:[#allocation5 + $0xe0] ss:$16 sps:$4 sm:$0xff]   ;;  %v96_v22 = vld [vmem:[#allocation2 + $0x68] sm:$0x11] }
  0x28   :  { %516 = vmatprep.mubr.bf16.mxu0 %v2074_v0  ;;  %71 = vperm.xlu0 %1743, %v66_v1   ;;  %v2135_v5 = vld [vmem:[#allocation5 + $0xc4] ss:$16 sps:$4 sm:$0xff]   ;;  %v2139_v6 = vld [vmem:[#allocation5 + $0xc0] ss:$16 sps:$4 sm:$0xff]   ;;  %v1629_v24 = vcombine.low %v96_v22, %v96_v22  ;;  %v1630_v26 = vcombine.high %v96_v22, %v96_v22  ;;  %v69_v34 = vand.u32 127, %v68_v33  ;;  %v2075_v37 = vmov 0.0  }
  0x29   :  { %484 = vmatprep.subr.bf16.mxu0 %v2131_v3  ;;  %v2142_v7 = vld [vmem:[#allocation5 + $0xa4] ss:$16 sps:$4 sm:$0xff]   ;;  %v2145_v11 = vld [vmem:[#allocation5 + $0xa0] ss:$16 sps:$4 sm:$0xff]   ;;  %vm189_vm3 = vcmask 408576   ;;  %vm2076_vm4 = vmmov 0  }
  0x2a   :  { %485 = vmatpush1.bf16.msra.mxu0 %v2133_v4  ;;  %v95_v8 = vld [vmem:[#allocation2 + $0x60] sm:$0x11]  ;;  %v201_v27 = vsel %vm193_vm0, %v1629_v24, 0  ;;  %v1783_v41 = vld [vmem:[#allocation2 + $0x4c] ss:$16 sps:$4 sm:$0xff]   ;;  %vm1482_vm5 = vcmask 1041408  }
  0x2b   :  { %486 = vmatprep.subr.bf16.mxu0 %v2135_v5  ;;  %v1628_v9 = vcombine.high %v95_v8, %v95_v8  ;;  %v1627_v10 = vcombine.low %v95_v8, %v95_v8  ;;  %v1760_v13 = vld [vmem:[#allocation2 + $0x44] ss:$16 sps:$4 sm:$0xff]   ;;  %v1763_v15 = vld [vmem:[#allocation2 + $0x40] ss:$16 sps:$4 sm:$0xff]   ;;  %v1781_v42 = vld [vmem:[#allocation2 + $0x48] ss:$16 sps:$4 sm:$0xff]  }
  0x2c   :  { %74 = vperm.xlu0 %1743, %v67_v2   ;;  %v2150_v14 = vld [vmem:[#allocation5 + $0x84] ss:$16 sps:$4 sm:$0xff]   ;;  %v2153_v17 = vld [vmem:[#allocation5 + $0x80] ss:$16 sps:$4 sm:$0xff]   ;;  %v1786_v43 = vld [vmem:[#allocation2 + $0x2c] ss:$16 sps:$4 sm:$0xff]  }
  0x2d   :  { %1631 = vmatprep.subr.msk.bf16.mxu1 %vm193_vm0, %v1628_v9  ;;  %v195_v12 = vsel %vm193_vm0, %v1627_v10, 0  ;;  %v1766_v16 = vld [vmem:[#allocation2 + $0x24] ss:$16 sps:$4 sm:$0xff]   ;;  %v1769_v19 = vld [vmem:[#allocation2 + $0x20] ss:$16 sps:$4 sm:$0xff]   ;;  %v100_v9 = vshrl.u32 %v68_v33, 7  ;;  %vm1700_vm6 = vmpackc.low %vm1482_vm5, %vm1482_vm5 }
  0x2e   :  { %487 = vmatpush1.bf16.msra.mxu0 %v2139_v6  ;;  %215 = vmatpush1.bf16.msra.mxu1 %v195_v12  ;;  %v2156_v18 = vld [vmem:[#allocation5 + $0x64] ss:$16 sps:$4 sm:$0xff]   ;;  %v2158_v21 = vld [vmem:[#allocation5 + $0x60] ss:$16 sps:$4 sm:$0xff]   ;;  %v1784_v44 = vld [vmem:[#allocation2 + $0x28] ss:$16 sps:$4 sm:$0xff]  }
  0x2f   :  { %488 = vmatprep.subr.bf16.mxu0 %v2142_v7  ;;  %216 = vmatprep.subr.bf16.mxu1 %v1760_v13  ;;  %v1772_v20 = vld [vmem:[#allocation2 + $0x4] ss:$16 sps:$4 sm:$0xff]   ;;  %v1775_v25 = vld [vmem:[#allocation2] ss:$16 sps:$4 sm:$0xff]   ;;  %v1789_v45 = vld [vmem:[#allocation2 + $0xc] ss:$16 sps:$4 sm:$0xff]  }
  0x30   :  { %v2161_v23 = vld [vmem:[#allocation5 + $0x44] ss:$16 sps:$4 sm:$0xff]   ;;  %v2166_v28 = vld [vmem:[#allocation5 + $0x40] ss:$16 sps:$4 sm:$0xff]   ;;  %v1787_v46 = vld [vmem:[#allocation2 + $0x8] ss:$16 sps:$4 sm:$0xff]  }
  0x31   :  { %v2169_v29 = vld [vmem:[#allocation5 + $0x24] ss:$16 sps:$4 sm:$0xff]   ;;  %v2171_v30 = vld [vmem:[#allocation5 + $0x20] ss:$16 sps:$4 sm:$0xff]   ;;  %v2207_v47 = vld [vmem:[#allocation5 + $0xec] ss:$16 sps:$4 sm:$0xff]  }
  0x32   :  { %489 = vmatpush1.bf16.msra.mxu0 %v2145_v11  ;;  %217 = vmatpush1.bf16.msra.mxu1 %v1763_v15  ;;  %v2174_v31 = vld [vmem:[#allocation5 + $0x4] ss:$16 sps:$4 sm:$0xff]   ;;  %v2178_v32 = vld [vmem:[#allocation5] ss:$16 sps:$4 sm:$0xff]   ;;  %v2209_v48 = vld [vmem:[#allocation5 + $0xe8] ss:$16 sps:$4 sm:$0xff]  }
  0x33   :  { %490 = vmatprep.subr.bf16.mxu0 %v2150_v14  ;;  %218 = vmatprep.subr.bf16.mxu1 %v1766_v16  ;;  %v2212_v49 = vld [vmem:[#allocation5 + $0xcc] ss:$16 sps:$4 sm:$0xff]   ;;  %v2216_v50 = vld [vmem:[#allocation5 + $0xc8] ss:$16 sps:$4 sm:$0xff]   ;;  %v101_v10 = vsub.s32 0, %v100_v9  ;;  %v105_v15 = vsub.s32 1, %v100_v9 }
  0x34   :  { %v2220_v51 = vld [vmem:[#allocation5 + $0xac] ss:$16 sps:$4 sm:$0xff]   ;;  %v2223_v52 = vld [vmem:[#allocation5 + $0xa8] ss:$16 sps:$4 sm:$0xff]   ;;  %v97_v12 = vld [vmem:[%s2593_s3] sm:$0xf] }
  0x35   :  { %v2226_v53 = vld [vmem:[#allocation5 + $0x8c] ss:$16 sps:$4 sm:$0xff]   ;;  %v2229_v54 = vld [vmem:[#allocation5 + $0x88] ss:$16 sps:$4 sm:$0xff]   ;;  %v106_v22 = vrot.slane %v97_v12, %v105_v15  ;;  %v113_v33 = vsub.s32 3, %v100_v9  ;;  %s2077_s19 = smov [#allocation8]  }
  0x36   :  { %491 = vmatpush1.bf16.msra.mxu0 %v2153_v17  ;;  %219 = vmatpush1.bf16.msra.mxu1 %v1769_v19  ;;  %v2232_v55 = vld [vmem:[#allocation5 + $0x6c] ss:$16 sps:$4 sm:$0xff]   ;;  %v2235_v56 = vld [vmem:[#allocation5 + $0x68] ss:$16 sps:$4 sm:$0xff]   ;;  %v102_v19 = vrot.slane %v97_v12, %v101_v10  ;;  %s1603_s20 = sshll.u32 %s2077_s19, 4  ;;  %s1604_s20 = int_to_ptr.vmem [resolvable:$true] %s1603_s20 }
  0x37   :  { %492 = vmatprep.subr.bf16.mxu0 %v2156_v18  ;;  %220 = vmatprep.subr.bf16.mxu1 %v1772_v20  ;;  %v2238_v57 = vld [vmem:[#allocation5 + $0x4c] ss:$16 sps:$4 sm:$0xff]   ;;  %v2241_v58 = vld [vmem:[#allocation5 + $0x48] ss:$16 sps:$4 sm:$0xff]   ;;  %s2041_s21 = scalar_lea.vmem %s1604_s20, 128  ;;  %p2046_p2 = scmp.lt.s32.totalorder %s1604_s20, %s1604_s20 }
  0x38   :  { %v2244_v59 = vld [vmem:[#allocation5 + $0x2c] ss:$16 sps:$4 sm:$0xff]   ;;  %v2247_v60 = vld [vmem:[#allocation5 + $0x28] ss:$16 sps:$4 sm:$0xff]   ;;  %p2042_p1 = scmp.ne.s32.totalorder %s1604_s20, %s2041_s21  ;;  %p2047_p3 = scmp.lt.s32.totalorder %s2041_s21, %s2041_s21 }
  0x39   :  { %v2250_v61 = vld [vmem:[#allocation5 + $0xc] ss:$16 sps:$4 sm:$0xff]   ;;  %v2253_v62 = vld [vmem:[#allocation5 + $0x8] ss:$16 sps:$4 sm:$0xff]  }
  0x3a   :  { %493 = vmatpush1.bf16.msra.mxu0 %v2158_v21  ;;  %221 = vmatpush1.bf16.msra.mxu1 %v1775_v25  ;;  %p2048_p4 = por %p2047_p3, %p2046_p2 }
  0x3b   :  { %494 = vmatprep.subr.bf16.mxu0 %v2161_v23  ;;  %1633 = vmatprep.subr.msk.bf16.mxu1 %vm193_vm0, %v1630_v26 }
  0x3c   :  { %p2049_p5 = pnand %p2048_p4, %p2042_p1 }
  0x3e   :  { %495 = vmatpush1.bf16.msra.mxu0 %v2166_v28 }
  0x3f   :  { %496 = vmatprep.subr.bf16.mxu0 %v2169_v29 }
  0x42   :  { %497 = vmatpush1.bf16.msra.mxu0 %v2171_v30 }
  0x43   :  { %498 = vmatprep.subr.bf16.mxu0 %v2174_v31 }
  0x46   :  { %499 = vmatpush1.bf16.msra.mxu0 %v2178_v32 }
  0x47   :  { %595 = vmatprep.subr.bf16.mxu0 %v2131_v3 }
  0x49   :  { %517 = vmatmul.mubr.bf16.vlgmr.msra.gmra.mxu0 %v2074_v0 }
  0x4a   :  { %596 = vmatpush1.bf16.msra.mxu0 %v2133_v4  ;;  %627 = vmatprep.mubr.bf16.mxu0 %v2074_v0 }
  0x4b   :  { %597 = vmatprep.subr.bf16.mxu0 %v2135_v5 }
  0x4e   :  { %598 = vmatpush1.bf16.msra.mxu0 %v2139_v6 }
  0x4f   :  { %599 = vmatprep.subr.bf16.mxu0 %v2142_v7 }
  0x52   :  { %600 = vmatpush1.bf16.msra.mxu0 %v2145_v11 }
  0x53   :  { %601 = vmatprep.subr.bf16.mxu0 %v2150_v14 }
  0x56   :  { %602 = vmatpush1.bf16.msra.mxu0 %v2153_v17 }
  0x57   :  { %603 = vmatprep.subr.bf16.mxu0 %v2156_v18 }
  0x5a   :  { %604 = vmatpush1.bf16.msra.mxu0 %v2158_v21 }
  0x5b   :  { %605 = vmatprep.subr.bf16.mxu0 %v2161_v23 }
  0x5e   :  { %606 = vmatpush1.bf16.msra.mxu0 %v2166_v28 }
  0x5f   :  { %607 = vmatprep.subr.bf16.mxu0 %v2169_v29 }
  0x62   :  { %608 = vmatpush1.bf16.msra.mxu0 %v2171_v30 }
  0x63   :  { %609 = vmatprep.subr.bf16.mxu0 %v2174_v31 }
  0x66   :  { %610 = vmatpush1.bf16.msra.mxu0 %v2178_v32 }
  0x67   :  { %724 = vmatprep.subr.bf16.mxu0 %v2131_v3 }
  0xa3   :  { %v72_v35 = vpop.permute.xlu0 %71 }
  0xa4   :  { %vm76_vm1 = vcmp.eq.s32.totalorder %v72_v35, %v69_v34 }
  0xa5   :  { %v1613_v38 = vsel %vm76_vm1, 1.0, %v2075_v37 }
  0xa7   :  { %v75_v36 = vpop.permute.xlu0 %74 }
  0xa8   :  { %vm77_vm2 = vcmp.eq.s32.totalorder %v75_v36, %v69_v34 }
  0xa9   :  { %v1614_v39 = vsel %vm77_vm2, 1.0, %v2075_v37 }
  0xaa   :  { %v82_v40 = vpack.c.bf16 %v1614_v39, %v1613_v38 }
  0xac   :  { %1632 = vmatmul.mubr.msk.bf16.vlgmr.msra.gmra.mxu1 %vm189_vm3, %v82_v40 }
  0xad   :  { %258 = vmatpush1.bf16.msra.mxu1 %v201_v27  ;;  %281 = vmatprep.mubr.bf16.mxu1 %v2074_v0  ;;  %v109_v27 = vsub.s32 2, %v100_v9 }
  0xae   :  { %259 = vmatprep.subr.bf16.mxu1 %v1783_v41 }
  0xaf   :  { %v110_v39 = vrot.slane %v97_v12, %v109_v27 }
  0xb1   :  { %260 = vmatpush1.bf16.msra.mxu1 %v1781_v42  ;;  %v114_v42 = vrot.slane %v97_v12, %v113_v33 }
  0xb2   :  { %261 = vmatprep.subr.bf16.mxu1 %v1786_v43 }
  0xb5   :  { %262 = vmatpush1.bf16.msra.mxu1 %v1784_v44 }
  0xb6   :  { %263 = vmatprep.subr.bf16.mxu1 %v1789_v45 }
  0xb9   :  { %264 = vmatpush1.bf16.msra.mxu1 %v1787_v46 }
  0xba   :  { %525 = vmatprep.subr.bf16.mxu1 %v2207_v47 }
  0xbc   :  { %1634 = vmatmul.mubr.msk.bf16.vlgmr.msra.gmra.mxu1 %vm189_vm3, %v82_v40 }
  0xbd   :  { %526 = vmatpush1.bf16.msra.mxu1 %v2209_v48  ;;  %557 = vmatprep.mubr.bf16.mxu1 %v2074_v0 }
  0xbe   :  { %527 = vmatprep.subr.bf16.mxu1 %v2212_v49 }
  0xc1   :  { %528 = vmatpush1.bf16.msra.mxu1 %v2216_v50 }
  0xc2   :  { %529 = vmatprep.subr.bf16.mxu1 %v2220_v51 }
  0xc5   :  { %530 = vmatpush1.bf16.msra.mxu1 %v2223_v52 }
  0xc6   :  { %531 = vmatprep.subr.bf16.mxu1 %v2226_v53 }
  0xc9   :  { %532 = vmatpush1.bf16.msra.mxu1 %v2229_v54 }
  0xca   :  { %533 = vmatprep.subr.bf16.mxu1 %v2232_v55 }
  0xcd   :  { %534 = vmatpush1.bf16.msra.mxu1 %v2235_v56 }
  0xce   :  { %535 = vmatprep.subr.bf16.mxu1 %v2238_v57 }
  0xd1   :  { %536 = vmatpush1.bf16.msra.mxu1 %v2241_v58 }
  0xd2   :  { %537 = vmatprep.subr.bf16.mxu1 %v2244_v59 }
  0xd5   :  { %538 = vmatpush1.bf16.msra.mxu1 %v2247_v60 }
  0xd6   :  { %539 = vmatprep.subr.bf16.mxu1 %v2250_v61 }
  0xd9   :  { %540 = vmatpush1.bf16.msra.mxu1 %v2253_v62 }
  0xda   :  { %636 = vmatprep.subr.bf16.mxu1 %v2207_v47 }
  0xdc   :  { %558 = vmatmul.mubr.bf16.vlgmr.msra.gmra.mxu1 %v2074_v0 }
  0xdd   :  { %637 = vmatpush1.bf16.msra.mxu1 %v2209_v48  ;;  %668 = vmatprep.mubr.bf16.mxu1 %v2074_v0 }
  0xde   :  { %638 = vmatprep.subr.bf16.mxu1 %v2212_v49 }
  0xe1   :  { %639 = vmatpush1.bf16.msra.mxu1 %v2216_v50 }
  0xe2   :  { %640 = vmatprep.subr.bf16.mxu1 %v2220_v51 }
  0xe5   :  { %641 = vmatpush1.bf16.msra.mxu1 %v2223_v52 }
  0xe6   :  { %642 = vmatprep.subr.bf16.mxu1 %v2226_v53 }
  0xe9   :  { %643 = vmatpush1.bf16.msra.mxu1 %v2229_v54 }
  0xea   :  { %644 = vmatprep.subr.bf16.mxu1 %v2232_v55 }
  0xed   :  { %645 = vmatpush1.bf16.msra.mxu1 %v2235_v56 }
  0xee   :  { %646 = vmatprep.subr.bf16.mxu1 %v2238_v57 }
  0xf1   :  { %647 = vmatpush1.bf16.msra.mxu1 %v2241_v58 }
  0xf2   :  { %648 = vmatprep.subr.bf16.mxu1 %v2244_v59 }
  0xf5   :  { %649 = vmatpush1.bf16.msra.mxu1 %v2247_v60 }
  0xf6   :  { %650 = vmatprep.subr.bf16.mxu1 %v2250_v61 }
  0xf9   :  { %651 = vmatpush1.bf16.msra.mxu1 %v2253_v62 }
  0xfa   :  { %765 = vmatprep.subr.bf16.mxu1 %v2207_v47 }
 0x109   :  { %v518_v63 = vpop.f32.mrf.mxu0 }
 0x10b   :  { %v520_v1 = vpop.f32.mrf.mxu0 }
 0x10d   :  { %v522_v2 = vpop.f32.mrf.mxu0 }
 0x10f   :  { %v523_v8 = vpop.f32.mrf.mxu0 }
 0x16c   :  { %v240_v13 = vpop.f32.mrf.mxu1 }
 0x16d   :  { %v2286_v36 = vadd.f32 %v240_v13, %v102_v19 }
 0x16e   :  { %v242_v16 = vpop.f32.mrf.mxu1 }
 0x16f   :  { %v2284_v35 = vadd.f32 %v242_v16, %v106_v22  ;;  %v566_v44 = vadd.f32 %v518_v63, %v2286_v36 }
 0x170   :  { %v244_v20 = vpop.f32.mrf.mxu1 }
 0x171   :  { %v2280_v24 = vadd.f32 %v244_v20, %v102_v19  ;;  %v567_v41 = vadd.f32 %v520_v1, %v2284_v35  ;;  %v1667_v8 = vmul.f32 -1.442695, %v566_v44 }
 0x172   :  { %v246_v25 = vpop.f32.mrf.mxu1 }
 0x173   :  { %v2282_v26 = vadd.f32 %v246_v25, %v106_v22  ;;  %v1668_v2 = vmul.f32 -1.442695, %v567_v41 }
 0x175   :  { %1822 = vpow2.f32 %v1668_v2 }
 0x176   :  { %1824 = vpow2.f32 %v1667_v8 }
 0x17c   :  { %v283_v34 = vpop.f32.mrf.mxu1 }
 0x17d   :  { %v2294_v16 = vadd.f32 %v283_v34, %v110_v39 }
 0x17e   :  { %v285_v38 = vpop.f32.mrf.mxu1 }
 0x17f   :  { %v2296_v1 = vadd.f32 %v285_v38, %v114_v42 }
 0x180   :  { %v287_v40 = vpop.f32.mrf.mxu1 }
 0x181   :  { %v2289_v43 = vadd.f32 %v287_v40, %v110_v39 }
 0x182   :  { %v289_v45 = vpop.f32.mrf.mxu1  ;;  %v1823_v9 = vpop.eup %1822 }
 0x183   :  { %v2292_v46 = vadd.f32 %v289_v45, %v114_v42  ;;  %v1825_v10 = vpop.eup %1824  ;;  %v579_v13 = vadd.f32 1.0, %v1823_v9 }
 0x184   :  { %v573_v15 = vadd.f32 1.0, %v1825_v10 }
 0x185   :  { %1826 = vrcp.f32 %v579_v13 }
 0x186   :  { %1828 = vrcp.f32 %v573_v15 }
 0x192   :  { %v1827_v33 = vpop.eup %1826 }
 0x193   :  { %v1829_v40 = vpop.eup %1828  ;;  %v589_v34 = vmul.f32 0.0, %v1827_v33 }
 0x19c   :  { %v559_v19 = vpop.f32.mrf.mxu1 }
 0x19d   :  { %v568_v12 = vadd.f32 %v559_v19, %v2294_v16 }
 0x19e   :  { %v561_v63 = vpop.f32.mrf.mxu1 }
 0x19f   :  { %1830 = vtanh.f32 %v568_v12  ;;  %v569_v20 = vadd.f32 %v561_v63, %v2296_v1 }
 0x1a0   :  { %v563_v22 = vpop.f32.mrf.mxu1 }
 0x1a1   :  { %v1669_v25 = vmul.f32 -1.442695, %v569_v20 }
 0x1a2   :  { %v564_v27 = vpop.f32.mrf.mxu1 }
 0x1a3   :  { %1832 = vpow2.f32 %v1669_v25 }
 0x1ac   :  { %v1831_v41 = vpop.eup %1830 }
 0x1ad   :  { %v590_v39 = vmul.f32 %v1831_v41, %v1829_v40 }
 0x1af   :  { %v2300_v44 = vadd.f32 %v590_v39, %v589_v34 }
 0x1b0   :  { %v1833_v38 = vpop.eup %1832 }
 0x1b1   :  { %v586_v42 = vadd.f32 1.0, %v1833_v38  ;;  %1834 = vtanh.f32 %v2300_v44 }
 0x1b3   :  { %1836 = vrcp.f32 %v586_v42 }
 0x1be   :  { %v1835_v45 = vpop.eup %1834 }
 0x1c0   :  { %v1837_v2 = vpop.eup %1836 }
 0x1c1   :  { %v593_v8 = vmul.f32 %v1837_v2, %v1835_v45 }
 0x1c3   :  { %v594_v9 = vpack.c.bf16 %v593_v8, %v593_v8 }
 0x1c5   :  { %628 = vmatmul.mubr.bf16.vlgmr.msra.gmra.mxu0 %v594_v9  ;;  %669 = vmatmul.mubr.bf16.vlgmr.msra.gmra.mxu1 %v594_v9 }
 0x1c6   :  { %725 = vmatpush1.bf16.msra.mxu0 %v2133_v4  ;;  %766 = vmatpush1.bf16.msra.mxu1 %v2209_v48 }
 0x1c7   :  { %726 = vmatprep.subr.bf16.mxu0 %v2135_v5  ;;  %767 = vmatprep.subr.bf16.mxu1 %v2212_v49 }
 0x1c8   :  { %756 = vmatprep.mubr.bf16.mxu0 %v2074_v0  ;;  %797 = vmatprep.mubr.bf16.mxu1 %v2074_v0 }
 0x1ca   :  { %727 = vmatpush1.bf16.msra.mxu0 %v2139_v6  ;;  %768 = vmatpush1.bf16.msra.mxu1 %v2216_v50 }
 0x1cb   :  { %728 = vmatprep.subr.bf16.mxu0 %v2142_v7  ;;  %769 = vmatprep.subr.bf16.mxu1 %v2220_v51 }
 0x1ce   :  { %729 = vmatpush1.bf16.msra.mxu0 %v2145_v11  ;;  %770 = vmatpush1.bf16.msra.mxu1 %v2223_v52 }
 0x1cf   :  { %730 = vmatprep.subr.bf16.mxu0 %v2150_v14  ;;  %771 = vmatprep.subr.bf16.mxu1 %v2226_v53 }
 0x1d2   :  { %731 = vmatpush1.bf16.msra.mxu0 %v2153_v17  ;;  %772 = vmatpush1.bf16.msra.mxu1 %v2229_v54 }
 0x1d3   :  { %732 = vmatprep.subr.bf16.mxu0 %v2156_v18  ;;  %773 = vmatprep.subr.bf16.mxu1 %v2232_v55 }
 0x1d6   :  { %733 = vmatpush1.bf16.msra.mxu0 %v2158_v21  ;;  %774 = vmatpush1.bf16.msra.mxu1 %v2235_v56 }
 0x1d7   :  { %734 = vmatprep.subr.bf16.mxu0 %v2161_v23  ;;  %775 = vmatprep.subr.bf16.mxu1 %v2238_v57 }
 0x1da   :  { %735 = vmatpush1.bf16.msra.mxu0 %v2166_v28  ;;  %776 = vmatpush1.bf16.msra.mxu1 %v2241_v58 }
 0x1db   :  { %736 = vmatprep.subr.bf16.mxu0 %v2169_v29  ;;  %777 = vmatprep.subr.bf16.mxu1 %v2244_v59 }
 0x1de   :  { %737 = vmatpush1.bf16.msra.mxu0 %v2171_v30  ;;  %778 = vmatpush1.bf16.msra.mxu1 %v2247_v60 }
 0x1df   :  { %738 = vmatprep.subr.bf16.mxu0 %v2174_v31  ;;  %779 = vmatprep.subr.bf16.mxu1 %v2250_v61 }
 0x1e2   :  { %739 = vmatpush1.bf16.msra.mxu0 %v2178_v32  ;;  %780 = vmatpush1.bf16.msra.mxu1 %v2253_v62 }
 0x1e3   :  { %853 = vmatprep.subr.bf16.mxu0 %v2131_v3  ;;  %894 = vmatprep.subr.bf16.mxu1 %v2207_v47 }
 0x285   :  { %v629_v10 = vpop.f32.mrf.mxu0  ;;  %v670_v13 = vpop.f32.mrf.mxu1 }
 0x286   :  { %v681_v15 = vrot.slane %v629_v10, 6  ;;  %v683_v42 = vrot.slane %v670_v13, 6 }
 0x287   :  { %v631_v19 = vpop.f32.mrf.mxu0  ;;  %v672_v12 = vpop.f32.mrf.mxu1 }
 0x288   :  { %v689_v63 = vadd.f32 %v681_v15, %v2286_v36  ;;  %v682_v20 = vrot.slane %v631_v19, 6  ;;  %v684_v39 = vrot.slane %v672_v12, 6  ;;  %v691_v8 = vadd.f32 %v683_v42, %v2294_v16 }
 0x289   :  { %v633_v22 = vpop.f32.mrf.mxu0  ;;  %v674_v25 = vpop.f32.mrf.mxu1 }
 0x28a   :  { %v1670_v27 = vmul.f32 -1.442695, %v689_v63  ;;  %v690_v33 = vadd.f32 %v682_v20, %v2284_v35  ;;  %v692_v38 = vadd.f32 %v684_v39, %v2296_v1  ;;  %v713_v22 = vrot.slane %v2300_v44, 6 }
 0x28b   :  { %v634_v40 = vpop.f32.mrf.mxu0  ;;  %v675_v41 = vpop.f32.mrf.mxu1 }
 0x28c   :  { %1838 = vpow2.f32 %v1670_v27  ;;  %v1671_v34 = vmul.f32 -1.442695, %v690_v33  ;;  %v1672_v45 = vmul.f32 -1.442695, %v692_v38 }
 0x28e   :  { %1840 = vpow2.f32 %v1671_v34 }
 0x28f   :  { %1842 = vpow2.f32 %v1672_v45 }
 0x299   :  { %v1839_v2 = vpop.eup %1838 }
 0x29a   :  { %v696_v9 = vadd.f32 1.0, %v1839_v2 }
 0x29b   :  { %v1841_v10 = vpop.eup %1840 }
 0x29c   :  { %1844 = vrcp.f32 %v696_v9  ;;  %v702_v15 = vadd.f32 1.0, %v1841_v10  ;;  %v1843_v19 = vpop.eup %1842 }
 0x29d   :  { %1846 = vtanh.f32 %v691_v8  ;;  %v709_v25 = vadd.f32 1.0, %v1843_v19 }
 0x29e   :  { %1848 = vrcp.f32 %v702_v15 }
 0x29f   :  { %1850 = vrcp.f32 %v709_v25 }
 0x2a9   :  { %v1845_v63 = vpop.eup %1844 }
 0x2aa   :  { %v1847_v20 = vpop.eup %1846 }
 0x2ab   :  { %v1849_v12 = vpop.eup %1848  ;;  %v716_v27 = vmul.f32 %v1847_v20, %v1845_v63 }
 0x2ac   :  { %v715_v13 = vmul.f32 %v1849_v12, %v713_v22  ;;  %v1851_v40 = vpop.eup %1850 }
 0x2ae   :  { %v2342_v33 = vadd.f32 %v716_v27, %v715_v13 }
 0x2b0   :  { %1852 = vtanh.f32 %v2342_v33 }
 0x2bd   :  { %v1853_v41 = vpop.eup %1852 }
 0x2be   :  { %v719_v34 = vmul.f32 %v1853_v41, %v1851_v40 }
 0x2c0   :  { %v720_v39 = vpack.c.bf16 %v719_v34, %v719_v34 }
 0x2c2   :  { %v722_v38 = vrot.slane %v720_v39, 1 }
 0x2c4   :  { %757 = vmatmul.mubr.bf16.vlgmr.msra.gmra.mxu0 %v722_v38  ;;  %798 = vmatmul.mubr.bf16.vlgmr.msra.gmra.mxu1 %v722_v38 }
 0x2c5   :  { %854 = vmatpush1.bf16.msra.mxu0 %v2133_v4  ;;  %895 = vmatpush1.bf16.msra.mxu1 %v2209_v48 }
 0x2c6   :  { %855 = vmatprep.subr.bf16.mxu0 %v2135_v5  ;;  %896 = vmatprep.subr.bf16.mxu1 %v2212_v49 }
 0x2c7   :  { %885 = vmatprep.mubr.bf16.mxu0 %v2074_v0  ;;  %926 = vmatprep.mubr.bf16.mxu1 %v2074_v0 }
 0x2c9   :  { %856 = vmatpush1.bf16.msra.mxu0 %v2139_v6  ;;  %897 = vmatpush1.bf16.msra.mxu1 %v2216_v50 }
 0x2ca   :  { %857 = vmatprep.subr.bf16.mxu0 %v2142_v7  ;;  %898 = vmatprep.subr.bf16.mxu1 %v2220_v51 }
 0x2cd   :  { %858 = vmatpush1.bf16.msra.mxu0 %v2145_v11  ;;  %899 = vmatpush1.bf16.msra.mxu1 %v2223_v52 }
 0x2ce   :  { %859 = vmatprep.subr.bf16.mxu0 %v2150_v14  ;;  %900 = vmatprep.subr.bf16.mxu1 %v2226_v53 }
 0x2d1   :  { %860 = vmatpush1.bf16.msra.mxu0 %v2153_v17  ;;  %901 = vmatpush1.bf16.msra.mxu1 %v2229_v54 }
 0x2d2   :  { %861 = vmatprep.subr.bf16.mxu0 %v2156_v18  ;;  %902 = vmatprep.subr.bf16.mxu1 %v2232_v55 }
 0x2d5   :  { %862 = vmatpush1.bf16.msra.mxu0 %v2158_v21  ;;  %903 = vmatpush1.bf16.msra.mxu1 %v2235_v56 }
 0x2d6   :  { %863 = vmatprep.subr.bf16.mxu0 %v2161_v23  ;;  %904 = vmatprep.subr.bf16.mxu1 %v2238_v57 }
 0x2d9   :  { %864 = vmatpush1.bf16.msra.mxu0 %v2166_v28  ;;  %905 = vmatpush1.bf16.msra.mxu1 %v2241_v58 }
 0x2da   :  { %865 = vmatprep.subr.bf16.mxu0 %v2169_v29  ;;  %906 = vmatprep.subr.bf16.mxu1 %v2244_v59 }
 0x2dd   :  { %866 = vmatpush1.bf16.msra.mxu0 %v2171_v30  ;;  %907 = vmatpush1.bf16.msra.mxu1 %v2247_v60 }
 0x2de   :  { %867 = vmatprep.subr.bf16.mxu0 %v2174_v31  ;;  %908 = vmatprep.subr.bf16.mxu1 %v2250_v61 }
 0x2e1   :  { %868 = vmatpush1.bf16.msra.mxu0 %v2178_v32  ;;  %909 = vmatpush1.bf16.msra.mxu1 %v2253_v62 }
 0x2e2   :  { %982 = vmatprep.subr.bf16.mxu0 %v2131_v3  ;;  %1023 = vmatprep.subr.bf16.mxu1 %v2207_v47 }
 0x384   :  { %v758_v44 = vpop.f32.mrf.mxu0  ;;  %v799_v42 = vpop.f32.mrf.mxu1 }
 0x385   :  { %v810_v45 = vrot.slane %v758_v44, 4  ;;  %v812_v40 = vrot.slane %v799_v42, 4 }
 0x386   :  { %v760_v2 = vpop.f32.mrf.mxu0  ;;  %v801_v8 = vpop.f32.mrf.mxu1 }
 0x387   :  { %v818_v9 = vadd.f32 %v810_v45, %v2286_v36  ;;  %v811_v10 = vrot.slane %v760_v2, 4  ;;  %v813_v27 = vrot.slane %v801_v8, 4  ;;  %v820_v39 = vadd.f32 %v812_v40, %v2294_v16 }
 0x388   :  { %v762_v15 = vpop.f32.mrf.mxu0  ;;  %v803_v19 = vpop.f32.mrf.mxu1 }
 0x389   :  { %v1673_v63 = vmul.f32 -1.442695, %v818_v9  ;;  %v819_v20 = vadd.f32 %v811_v10, %v2284_v35  ;;  %v821_v13 = vadd.f32 %v813_v27, %v2296_v1  ;;  %v842_v15 = vrot.slane %v2342_v33, 6 }
 0x38a   :  { %v763_v22 = vpop.f32.mrf.mxu0  ;;  %v804_v12 = vpop.f32.mrf.mxu1 }
 0x38b   :  { %1854 = vpow2.f32 %v1673_v63  ;;  %v1674_v25 = vmul.f32 -1.442695, %v819_v20  ;;  %v1675_v41 = vmul.f32 -1.442695, %v821_v13 }
 0x38d   :  { %1856 = vpow2.f32 %v1674_v25 }
 0x38e   :  { %1858 = vpow2.f32 %v1675_v41 }
 0x398   :  { %v1855_v34 = vpop.eup %1854 }
 0x399   :  { %v825_v38 = vadd.f32 1.0, %v1855_v34 }
 0x39a   :  { %v1857_v44 = vpop.eup %1856 }
 0x39b   :  { %1860 = vrcp.f32 %v825_v38  ;;  %v831_v45 = vadd.f32 1.0, %v1857_v44  ;;  %v1859_v2 = vpop.eup %1858 }
 0x39c   :  { %1862 = vtanh.f32 %v820_v39  ;;  %v838_v19 = vadd.f32 1.0, %v1859_v2 }
 0x39d   :  { %1864 = vrcp.f32 %v831_v45 }
 0x39e   :  { %1866 = vrcp.f32 %v838_v19 }
 0x3a8   :  { %v1861_v9 = vpop.eup %1860 }
 0x3a9   :  { %v1863_v10 = vpop.eup %1862 }
 0x3aa   :  { %v1865_v8 = vpop.eup %1864  ;;  %v845_v63 = vmul.f32 %v1863_v10, %v1861_v9 }
 0x3ab   :  { %v844_v42 = vmul.f32 %v1865_v8, %v842_v15  ;;  %v1867_v22 = vpop.eup %1866 }
 0x3ad   :  { %v2384_v20 = vadd.f32 %v845_v63, %v844_v42 }
 0x3af   :  { %1868 = vtanh.f32 %v2384_v20 }
 0x3bc   :  { %v1869_v12 = vpop.eup %1868 }
 0x3bd   :  { %v848_v25 = vmul.f32 %v1869_v12, %v1867_v22 }
 0x3bf   :  { %v849_v27 = vpack.c.bf16 %v848_v25, %v848_v25 }
 0x3c1   :  { %v851_v13 = vrot.slane %v849_v27, 2  ;;  %v971_v27 = vrot.slane %v2384_v20, 6  ;;  %v2433_v20 = vld [vmem:[#allocation5 + $0xc4] ss:$16 sps:$4 sm:$0xff]  }
 0x3c3   :  { %886 = vmatmul.mubr.bf16.vlgmr.msra.gmra.mxu0 %v851_v13  ;;  %927 = vmatmul.mubr.bf16.vlgmr.msra.gmra.mxu1 %v851_v13 }
 0x3c4   :  { %983 = vmatpush1.bf16.msra.mxu0 %v2133_v4  ;;  %1024 = vmatpush1.bf16.msra.mxu1 %v2209_v48 }
 0x3c5   :  { %984 = vmatprep.subr.bf16.mxu0 %v2135_v5  ;;  %1025 = vmatprep.subr.bf16.mxu1 %v2212_v49 }
 0x3c6   :  { %1014 = vmatprep.mubr.bf16.mxu0 %v2074_v0  ;;  %1055 = vmatprep.mubr.bf16.mxu1 %v2074_v0 }
 0x3c8   :  { %985 = vmatpush1.bf16.msra.mxu0 %v2139_v6  ;;  %1026 = vmatpush1.bf16.msra.mxu1 %v2216_v50 }
 0x3c9   :  { %986 = vmatprep.subr.bf16.mxu0 %v2142_v7  ;;  %1027 = vmatprep.subr.bf16.mxu1 %v2220_v51 }
 0x3cc   :  { %987 = vmatpush1.bf16.msra.mxu0 %v2145_v11  ;;  %1028 = vmatpush1.bf16.msra.mxu1 %v2223_v52 }
 0x3cd   :  { %988 = vmatprep.subr.bf16.mxu0 %v2150_v14  ;;  %1029 = vmatprep.subr.bf16.mxu1 %v2226_v53 }
 0x3d0   :  { %989 = vmatpush1.bf16.msra.mxu0 %v2153_v17  ;;  %1030 = vmatpush1.bf16.msra.mxu1 %v2229_v54 }
 0x3d1   :  { %990 = vmatprep.subr.bf16.mxu0 %v2156_v18  ;;  %1031 = vmatprep.subr.bf16.mxu1 %v2232_v55 }
 0x3d4   :  { %991 = vmatpush1.bf16.msra.mxu0 %v2158_v21  ;;  %1032 = vmatpush1.bf16.msra.mxu1 %v2235_v56 }
 0x3d5   :  { %992 = vmatprep.subr.bf16.mxu0 %v2161_v23  ;;  %1033 = vmatprep.subr.bf16.mxu1 %v2238_v57 }
 0x3d8   :  { %993 = vmatpush1.bf16.msra.mxu0 %v2166_v28  ;;  %1034 = vmatpush1.bf16.msra.mxu1 %v2241_v58 }
 0x3d9   :  { %994 = vmatprep.subr.bf16.mxu0 %v2169_v29  ;;  %1035 = vmatprep.subr.bf16.mxu1 %v2244_v59 }
 0x3dc   :  { %995 = vmatpush1.bf16.msra.mxu0 %v2171_v30  ;;  %1036 = vmatpush1.bf16.msra.mxu1 %v2247_v60 }
 0x3dd   :  { %996 = vmatprep.subr.bf16.mxu0 %v2174_v31  ;;  %1037 = vmatprep.subr.bf16.mxu1 %v2250_v61 }
 0x3e0   :  { %997 = vmatpush1.bf16.msra.mxu0 %v2178_v32  ;;  %1038 = vmatpush1.bf16.msra.mxu1 %v2253_v62 }
 0x3e1   :  { %1096 = vmatprep.subr.bf16.mxu0 %v2131_v3  ;;  %1137 = vmatprep.subr.bf16.mxu1 %v2207_v47 }
 0x483   :  { %v887_v4 = vpop.f32.mrf.mxu0  ;;  %v928_v5 = vpop.f32.mrf.mxu1 }
 0x484   :  { %v939_v6 = vrot.slane %v887_v4, 2  ;;  %v941_v15 = vrot.slane %v928_v5, 2 }
 0x485   :  { %v889_v7 = vpop.f32.mrf.mxu0  ;;  %v930_v33 = vpop.f32.mrf.mxu1 }
 0x486   :  { %v947_v40 = vadd.f32 %v939_v6, %v2286_v36  ;;  %v940_v41 = vrot.slane %v889_v7, 2  ;;  %v942_v3 = vrot.slane %v930_v33, 2  ;;  %v949_v63 = vadd.f32 %v941_v15, %v2294_v16 }
 0x487   :  { %v891_v34 = vpop.f32.mrf.mxu0  ;;  %v932_v39 = vpop.f32.mrf.mxu1 }
 0x488   :  { %v1676_v38 = vmul.f32 -1.442695, %v947_v40  ;;  %v948_v44 = vadd.f32 %v940_v41, %v2284_v35  ;;  %v950_v10 = vadd.f32 %v942_v3, %v2296_v1  ;;  %v2429_v34 = vld [vmem:[#allocation5 + $0xe0] ss:$16 sps:$4 sm:$0xff]  }
 0x489   :  { %v892_v45 = vpop.f32.mrf.mxu0  ;;  %v933_v2 = vpop.f32.mrf.mxu1  ;;  %v2439_v39 = vld [vmem:[#allocation5 + $0xc0] ss:$16 sps:$4 sm:$0xff]  }
 0x48a   :  { %1870 = vpow2.f32 %v1676_v38  ;;  %v1677_v9 = vmul.f32 -1.442695, %v948_v44  ;;  %v1678_v8 = vmul.f32 -1.442695, %v950_v10  ;;  %v2443_v38 = vld [vmem:[#allocation5 + $0xa4] ss:$16 sps:$4 sm:$0xff]  }
 0x48c   :  { %1872 = vpow2.f32 %v1677_v9 }
 0x48d   :  { %1874 = vpow2.f32 %v1678_v8 }
 0x497   :  { %v1871_v19 = vpop.eup %1870 }
 0x498   :  { %v954_v36 = vadd.f32 1.0, %v1871_v19 }
 0x499   :  { %v1873_v42 = vpop.eup %1872 }
 0x49a   :  { %1876 = vrcp.f32 %v954_v36  ;;  %v960_v22 = vadd.f32 1.0, %v1873_v42  ;;  %v1875_v35 = vpop.eup %1874 }
 0x49b   :  { %1878 = vtanh.f32 %v949_v63  ;;  %v967_v4 = vadd.f32 1.0, %v1875_v35 }
 0x49c   :  { %1880 = vrcp.f32 %v960_v22 }
 0x49d   :  { %1882 = vrcp.f32 %v967_v4 }
 0x4a7   :  { %v1877_v12 = vpop.eup %1876 }
 0x4a8   :  { %v1879_v25 = vpop.eup %1878 }
 0x4a9   :  { %v1881_v13 = vpop.eup %1880  ;;  %v974_v1 = vmul.f32 %v1879_v25, %v1877_v12 }
 0x4aa   :  { %v973_v5 = vmul.f32 %v1881_v13, %v971_v27  ;;  %v1883_v16 = vpop.eup %1882 }
 0x4ac   :  { %v2426_v6 = vadd.f32 %v974_v1, %v973_v5 }
 0x4ae   :  { %1884 = vtanh.f32 %v2426_v6  ;;  %v1088_v22 = vrot.slane %v2426_v6, 6  ;;  %v2491_v6 = vld [vmem:[#allocation5 + $0xa0] ss:$16 sps:$4 sm:$0xff]  }
 0x4bb   :  { %v1885_v7 = vpop.eup %1884 }
 0x4bc   :  { %v977_v33 = vmul.f32 %v1885_v7, %v1883_v16 }
 0x4be   :  { %v978_v40 = vpack.c.bf16 %v977_v33, %v977_v33 }
 0x4c0   :  { %v980_v41 = vrot.slane %v978_v40, 3 }
 0x4c2   :  { %1015 = vmatmul.mubr.bf16.vlgmr.msra.gmra.mxu0 %v980_v41  ;;  %1056 = vmatmul.mubr.bf16.vlgmr.msra.gmra.mxu1 %v980_v41 }
 0x4c3   :  { %1097 = vmatpush1.bf16.msra.mxu0 %v2429_v34  ;;  %1138 = vmatpush1.bf16.msra.mxu1 %v2209_v48 }
 0x4c4   :  { %1098 = vmatprep.subr.bf16.mxu0 %v2433_v20  ;;  %1139 = vmatprep.subr.bf16.mxu1 %v2212_v49 }
 0x4c5   :  { %1128 = vmatprep.mubr.bf16.mxu0 %v2074_v0  ;;  %1169 = vmatprep.mubr.bf16.mxu1 %v2074_v0 }
 0x4c7   :  { %1099 = vmatpush1.bf16.msra.mxu0 %v2439_v39  ;;  %1140 = vmatpush1.bf16.msra.mxu1 %v2216_v50 }
 0x4c8   :  { %1100 = vmatprep.subr.bf16.mxu0 %v2443_v38  ;;  %1141 = vmatprep.subr.bf16.mxu1 %v2220_v51 }
 0x4cb   :  { %1101 = vmatpush1.bf16.msra.mxu0 %v2145_v11  ;;  %1142 = vmatpush1.bf16.msra.mxu1 %v2223_v52  ;;  %v2469_v11 = vld [vmem:[#allocation5 + $0xe4] ss:$16 sps:$4 sm:$0xff]  }
 0x4cc   :  { %1102 = vmatprep.subr.bf16.mxu0 %v2150_v14  ;;  %1143 = vmatprep.subr.bf16.mxu1 %v2226_v53 }
 0x4cf   :  { %1103 = vmatpush1.bf16.msra.mxu0 %v2153_v17  ;;  %1144 = vmatpush1.bf16.msra.mxu1 %v2229_v54 }
 0x4d0   :  { %1104 = vmatprep.subr.bf16.mxu0 %v2156_v18  ;;  %1145 = vmatprep.subr.bf16.mxu1 %v2232_v55 }
 0x4d3   :  { %1105 = vmatpush1.bf16.msra.mxu0 %v2158_v21  ;;  %1146 = vmatpush1.bf16.msra.mxu1 %v2235_v56 }
 0x4d4   :  { %1106 = vmatprep.subr.bf16.mxu0 %v2161_v23  ;;  %1147 = vmatprep.subr.bf16.mxu1 %v2238_v57 }
 0x4d7   :  { %1107 = vmatpush1.bf16.msra.mxu0 %v2166_v28  ;;  %1148 = vmatpush1.bf16.msra.mxu1 %v2241_v58 }
 0x4d8   :  { %1108 = vmatprep.subr.bf16.mxu0 %v2169_v29  ;;  %1149 = vmatprep.subr.bf16.mxu1 %v2244_v59 }
 0x4db   :  { %1109 = vmatpush1.bf16.msra.mxu0 %v2171_v30  ;;  %1150 = vmatpush1.bf16.msra.mxu1 %v2247_v60 }
 0x4dc   :  { %1110 = vmatprep.subr.bf16.mxu0 %v2174_v31  ;;  %1151 = vmatprep.subr.bf16.mxu1 %v2250_v61 }
 0x4df   :  { %1111 = vmatpush1.bf16.msra.mxu0 %v2178_v32  ;;  %1152 = vmatpush1.bf16.msra.mxu1 %v2253_v62 }
 0x4e0   :  { %1225 = vmatprep.subr.bf16.mxu0 %v2469_v11  ;;  %1266 = vmatprep.subr.bf16.mxu1 %v2207_v47 }
 0x582   :  { %v1016_v14 = vpop.f32.mrf.mxu0  ;;  %v1057_v17 = vpop.f32.mrf.mxu1 }
 0x583   :  { %v1064_v18 = vadd.f32 %v1016_v14, %v2280_v24  ;;  %v1066_v10 = vadd.f32 %v1057_v17, %v2289_v43 }
 0x584   :  { %v1018_v21 = vpop.f32.mrf.mxu0  ;;  %v1059_v23 = vpop.f32.mrf.mxu1 }
 0x585   :  { %v1679_v28 = vmul.f32 -1.442695, %v1064_v18  ;;  %v1065_v29 = vadd.f32 %v1018_v21, %v2282_v26  ;;  %v1067_v2 = vadd.f32 %v1059_v23, %v2292_v46 }
 0x586   :  { %v1020_v30 = vpop.f32.mrf.mxu0  ;;  %v1061_v31 = vpop.f32.mrf.mxu1 }
 0x587   :  { %1886 = vpow2.f32 %v1679_v28  ;;  %v1680_v32 = vmul.f32 -1.442695, %v1065_v29  ;;  %v1681_v9 = vmul.f32 -1.442695, %v1067_v2 }
 0x588   :  { %v1021_v44 = vpop.f32.mrf.mxu0  ;;  %v1062_v45 = vpop.f32.mrf.mxu1 }
 0x589   :  { %1888 = vpow2.f32 %v1680_v32 }
 0x58a   :  { %1890 = vpow2.f32 %v1681_v9 }
 0x594   :  { %v1887_v3 = vpop.eup %1886 }
 0x595   :  { %v1071_v15 = vadd.f32 1.0, %v1887_v3 }
 0x596   :  { %v1889_v8 = vpop.eup %1888 }
 0x597   :  { %1892 = vrcp.f32 %v1071_v15  ;;  %v1077_v19 = vadd.f32 1.0, %v1889_v8  ;;  %v1891_v63 = vpop.eup %1890 }
 0x598   :  { %1894 = vtanh.f32 %v1066_v10  ;;  %v1084_v12 = vadd.f32 1.0, %v1891_v63 }
 0x599   :  { %1896 = vrcp.f32 %v1077_v19 }
 0x59a   :  { %1898 = vrcp.f32 %v1084_v12 }
 0x5a4   :  { %v1893_v36 = vpop.eup %1892 }
 0x5a5   :  { %v1895_v42 = vpop.eup %1894 }
 0x5a6   :  { %v1897_v35 = vpop.eup %1896  ;;  %v1091_v25 = vmul.f32 %v1895_v42, %v1893_v36 }
 0x5a7   :  { %v1090_v27 = vmul.f32 %v1897_v35, %v1088_v22  ;;  %v1899_v4 = vpop.eup %1898 }
 0x5a9   :  { %v2478_v13 = vadd.f32 %v1091_v25, %v1090_v27  ;;  %v1966_v27 = vld [vmem:[#allocation5 + $0xe8] ss:$16 sps:$4 sm:$0xff]  }
 0x5ab   :  { %1900 = vtanh.f32 %v2478_v13  ;;  %v1214_v10 = vrot.slane %v2478_v13, 6  ;;  %v1967_v13 = vld [vmem:[#allocation5 + $0xcc] ss:$16 sps:$4 sm:$0xff]  }
 0x5b8   :  { %v1901_v1 = vpop.eup %1900 }
 0x5b9   :  { %v1094_v5 = vmul.f32 %v1901_v1, %v1899_v4  ;;  %v1968_v4 = vld [vmem:[#allocation5 + $0xc8] ss:$16 sps:$4 sm:$0xff]   ;;  %v1969_v1 = vld [vmem:[#allocation5 + $0xac] ss:$16 sps:$4 sm:$0xff]  }
 0x5bb   :  { %v1095_v16 = vpack.c.bf16 %v1094_v5, %v1094_v5  ;;  %v1972_v5 = vld [vmem:[#allocation5 + $0x88] ss:$16 sps:$4 sm:$0xff]  }
 0x5bd   :  { %1129 = vmatmul.mubr.bf16.vlgmr.msra.gmra.mxu0 %v1095_v16  ;;  %1170 = vmatmul.mubr.bf16.vlgmr.msra.gmra.mxu1 %v1095_v16  ;;  %v1976_v16 = vld [vmem:[#allocation5 + $0x48] ss:$16 sps:$4 sm:$0xff]  }
 0x5be   :  { %1226 = vmatpush1.bf16.msra.mxu0 %v2429_v34  ;;  %1267 = vmatpush1.bf16.msra.mxu1 %v2209_v48  ;;  %v2495_v48 = vld [vmem:[#allocation5 + $0x84] ss:$16 sps:$4 sm:$0xff]  }
 0x5bf   :  { %1227 = vmatprep.subr.bf16.mxu0 %v2433_v20  ;;  %1268 = vmatprep.subr.bf16.mxu1 %v2212_v49  ;;  %v2499_v49 = vld [vmem:[#allocation5 + $0x80] ss:$16 sps:$4 sm:$0xff]  }
 0x5c0   :  { %1257 = vmatprep.mubr.bf16.mxu0 %v2074_v0  ;;  %1298 = vmatprep.mubr.bf16.mxu1 %v2074_v0 }
 0x5c2   :  { %1228 = vmatpush1.bf16.msra.mxu0 %v2439_v39  ;;  %1269 = vmatpush1.bf16.msra.mxu1 %v2216_v50  ;;  %v2503_v50 = vld [vmem:[#allocation5 + $0x64] ss:$16 sps:$4 sm:$0xff]  }
 0x5c3   :  { %1229 = vmatprep.subr.bf16.mxu0 %v2443_v38  ;;  %1270 = vmatprep.subr.bf16.mxu1 %v2220_v51  ;;  %v2507_v51 = vld [vmem:[#allocation5 + $0x60] ss:$16 sps:$4 sm:$0xff]  }
 0x5c6   :  { %1230 = vmatpush1.bf16.msra.mxu0 %v2491_v6  ;;  %1271 = vmatpush1.bf16.msra.mxu1 %v2223_v52  ;;  %v2511_v52 = vld [vmem:[#allocation5 + $0x44] ss:$16 sps:$4 sm:$0xff]  }
 0x5c7   :  { %1231 = vmatprep.subr.bf16.mxu0 %v2495_v48  ;;  %1272 = vmatprep.subr.bf16.mxu1 %v2226_v53  ;;  %v2515_v53 = vld [vmem:[#allocation5 + $0x40] ss:$16 sps:$4 sm:$0xff]  }
 0x5ca   :  { %1232 = vmatpush1.bf16.msra.mxu0 %v2499_v49  ;;  %1273 = vmatpush1.bf16.msra.mxu1 %v2229_v54  ;;  %v2519_v54 = vld [vmem:[#allocation5 + $0x24] ss:$16 sps:$4 sm:$0xff]  }
 0x5cb   :  { %1233 = vmatprep.subr.bf16.mxu0 %v2503_v50  ;;  %1274 = vmatprep.subr.bf16.mxu1 %v2232_v55  ;;  %v2523_v55 = vld [vmem:[#allocation5 + $0x20] ss:$16 sps:$4 sm:$0xff]  }
 0x5ce   :  { %1234 = vmatpush1.bf16.msra.mxu0 %v2507_v51  ;;  %1275 = vmatpush1.bf16.msra.mxu1 %v2235_v56  ;;  %v2527_v56 = vld [vmem:[#allocation5 + $0x4] ss:$16 sps:$4 sm:$0xff]  }
 0x5cf   :  { %1235 = vmatprep.subr.bf16.mxu0 %v2511_v52  ;;  %1276 = vmatprep.subr.bf16.mxu1 %v2238_v57  ;;  %v2531_v57 = vld [vmem:[#allocation5] ss:$16 sps:$4 sm:$0xff]  }
 0x5d2   :  { %1236 = vmatpush1.bf16.msra.mxu0 %v2515_v53  ;;  %1277 = vmatpush1.bf16.msra.mxu1 %v2241_v58 }
 0x5d3   :  { %1237 = vmatprep.subr.bf16.mxu0 %v2519_v54  ;;  %1278 = vmatprep.subr.bf16.mxu1 %v2244_v59 }
 0x5d6   :  { %1238 = vmatpush1.bf16.msra.mxu0 %v2523_v55  ;;  %1279 = vmatpush1.bf16.msra.mxu1 %v2247_v60 }
 0x5d7   :  { %1239 = vmatprep.subr.bf16.mxu0 %v2527_v56  ;;  %1280 = vmatprep.subr.bf16.mxu1 %v2250_v61 }
 0x5da   :  { %1240 = vmatpush1.bf16.msra.mxu0 %v2531_v57  ;;  %1281 = vmatpush1.bf16.msra.mxu1 %v2253_v62 }
 0x5db   :  { %1354 = vmatprep.subr.bf16.mxu0 %v2469_v11  ;;  %1395 = vmatprep.subr.bf16.mxu1 %v2207_v47 }
 0x67d   :  { %v1130_v58 = vpop.f32.mrf.mxu0  ;;  %v1171_v59 = vpop.f32.mrf.mxu1 }
 0x67e   :  { %v1182_v7 = vrot.slane %v1130_v58, 6  ;;  %v1184_v28 = vrot.slane %v1171_v59, 6 }
 0x67f   :  { %v1132_v60 = vpop.f32.mrf.mxu0  ;;  %v1173_v33 = vpop.f32.mrf.mxu1 }
 0x680   :  { %v1190_v40 = vadd.f32 %v1182_v7, %v2280_v24  ;;  %v1183_v41 = vrot.slane %v1132_v60, 6  ;;  %v1185_v11 = vrot.slane %v1173_v33, 6  ;;  %v1192_v31 = vadd.f32 %v1184_v28, %v2289_v43 }
 0x681   :  { %v1134_v14 = vpop.f32.mrf.mxu0  ;;  %v1175_v61 = vpop.f32.mrf.mxu1 }
 0x682   :  { %v1682_v17 = vmul.f32 -1.442695, %v1190_v40  ;;  %v1191_v18 = vadd.f32 %v1183_v41, %v2282_v26  ;;  %v1193_v47 = vadd.f32 %v1185_v11, %v2292_v46 }
 0x683   :  { %v1135_v21 = vpop.f32.mrf.mxu0  ;;  %v1176_v23 = vpop.f32.mrf.mxu1 }
 0x684   :  { %1902 = vpow2.f32 %v1682_v17  ;;  %v1683_v62 = vmul.f32 -1.442695, %v1191_v18  ;;  %v1684_v29 = vmul.f32 -1.442695, %v1193_v47 }
 0x686   :  { %1904 = vpow2.f32 %v1683_v62 }
 0x687   :  { %1906 = vpow2.f32 %v1684_v29 }
 0x691   :  { %v1903_v30 = vpop.eup %1902 }
 0x692   :  { %v1197_v32 = vadd.f32 1.0, %v1903_v30 }
 0x693   :  { %v1905_v44 = vpop.eup %1904 }
 0x694   :  { %1908 = vrcp.f32 %v1197_v32  ;;  %v1203_v45 = vadd.f32 1.0, %v1905_v44  ;;  %v1907_v2 = vpop.eup %1906 }
 0x695   :  { %1910 = vtanh.f32 %v1192_v31  ;;  %v1210_v8 = vadd.f32 1.0, %v1907_v2 }
 0x696   :  { %1912 = vrcp.f32 %v1203_v45 }
 0x697   :  { %1914 = vrcp.f32 %v1210_v8 }
 0x6a1   :  { %v1909_v9 = vpop.eup %1908 }
 0x6a2   :  { %v1911_v3 = vpop.eup %1910 }
 0x6a3   :  { %v1913_v15 = vpop.eup %1912  ;;  %v1217_v19 = vmul.f32 %v1911_v3, %v1909_v9 }
 0x6a4   :  { %v1216_v63 = vmul.f32 %v1913_v15, %v1214_v10  ;;  %v1915_v42 = vpop.eup %1914 }
 0x6a6   :  { %v2542_v36 = vadd.f32 %v1217_v19, %v1216_v63  ;;  %v1814_v63 = vld [vmem:[#allocation7 + $0x38] sm:$0xff]  }
 0x6a8   :  { %1916 = vtanh.f32 %v2542_v36  ;;  %v1343_v31 = vrot.slane %v2542_v36, 6  ;;  %v1815_v36 = vld [vmem:[#allocation7 + $0x30] sm:$0xff]  }
 0x6b5   :  { %v1917_v22 = vpop.eup %1916 }
 0x6b6   :  { %v1220_v35 = vmul.f32 %v1917_v22, %v1915_v42  ;;  %v1816_v42 = vld [vmem:[#allocation7 + $0x28] sm:$0xff]   ;;  %v1817_v22 = vld [vmem:[#allocation7 + $0x20] sm:$0xff]  }
 0x6b8   :  { %v1221_v12 = vpack.c.bf16 %v1220_v35, %v1220_v35  ;;  %v1818_v35 = vld [vmem:[#allocation7 + $0x18] sm:$0xff]  }
 0x6ba   :  { %v1223_v25 = vrot.slane %v1221_v12, 1  ;;  %v1819_v12 = vld [vmem:[#allocation7 + $0x10] sm:$0xff]  }
 0x6bc   :  { %1258 = vmatmul.mubr.bf16.vlgmr.msra.gmra.mxu0 %v1223_v25  ;;  %1299 = vmatmul.mubr.bf16.vlgmr.msra.gmra.mxu1 %v1223_v25  ;;  %v1820_v25 = vld [vmem:[#allocation7 + $0x8] sm:$0xff]  }
 0x6bd   :  { %1355 = vmatpush1.bf16.msra.mxu0 %v2429_v34  ;;  %1396 = vmatpush1.bf16.msra.mxu1 %v1966_v27  ;;  %v1970_v34 = vld [vmem:[#allocation5 + $0xa8] ss:$16 sps:$4 sm:$0xff]   ;;  %v1821_v27 = vld [vmem:[#allocation7] sm:$0xff]  }
 0x6be   :  { %1356 = vmatprep.subr.bf16.mxu0 %v2433_v20  ;;  %1397 = vmatprep.subr.bf16.mxu1 %v1967_v13  ;;  %v1971_v20 = vld [vmem:[#allocation5 + $0x8c] ss:$16 sps:$4 sm:$0xff]  }
 0x6bf   :  { %1386 = vmatprep.mubr.bf16.mxu0 %v2074_v0  ;;  %1427 = vmatprep.mubr.bf16.mxu1 %v2074_v0  ;;  %v1973_v0 = vld [vmem:[#allocation5 + $0x6c] ss:$16 sps:$4 sm:$0xff]  }
 0x6c1   :  { %1357 = vmatpush1.bf16.msra.mxu0 %v2439_v39  ;;  %1398 = vmatpush1.bf16.msra.mxu1 %v1968_v4  ;;  %v1974_v39 = vld [vmem:[#allocation5 + $0x68] ss:$16 sps:$4 sm:$0xff]  }
 0x6c2   :  { %1358 = vmatprep.subr.bf16.mxu0 %v2443_v38  ;;  %1399 = vmatprep.subr.bf16.mxu1 %v1969_v1  ;;  %v1975_v38 = vld [vmem:[#allocation5 + $0x4c] ss:$16 sps:$4 sm:$0xff]  }
 0x6c5   :  { %1359 = vmatpush1.bf16.msra.mxu0 %v2491_v6  ;;  %1400 = vmatpush1.bf16.msra.mxu1 %v1970_v34  ;;  %v1977_v6 = vld [vmem:[#allocation5 + $0x2c] ss:$16 sps:$4 sm:$0xff]  }
 0x6c6   :  { %1360 = vmatprep.subr.bf16.mxu0 %v2495_v48  ;;  %1401 = vmatprep.subr.bf16.mxu1 %v1971_v20  ;;  %v1978_v48 = vld [vmem:[#allocation5 + $0x28] ss:$16 sps:$4 sm:$0xff]  }
 0x6c9   :  { %1361 = vmatpush1.bf16.msra.mxu0 %v2499_v49  ;;  %1402 = vmatpush1.bf16.msra.mxu1 %v1972_v5  ;;  %v1979_v49 = vld [vmem:[#allocation5 + $0xc] ss:$16 sps:$4 sm:$0xff]  }
 0x6ca   :  { %1362 = vmatprep.subr.bf16.mxu0 %v2503_v50  ;;  %1403 = vmatprep.subr.bf16.mxu1 %v1973_v0  ;;  %v1980_v50 = vld [vmem:[#allocation5 + $0x8] ss:$16 sps:$4 sm:$0xff]  }
 0x6cd   :  { %1363 = vmatpush1.bf16.msra.mxu0 %v2507_v51  ;;  %1404 = vmatpush1.bf16.msra.mxu1 %v1974_v39 }
 0x6ce   :  { %1364 = vmatprep.subr.bf16.mxu0 %v2511_v52  ;;  %1405 = vmatprep.subr.bf16.mxu1 %v1975_v38 }
 0x6d1   :  { %1365 = vmatpush1.bf16.msra.mxu0 %v2515_v53  ;;  %1406 = vmatpush1.bf16.msra.mxu1 %v1976_v16 }
 0x6d2   :  { %1366 = vmatprep.subr.bf16.mxu0 %v2519_v54  ;;  %1407 = vmatprep.subr.bf16.mxu1 %v1977_v6 }
 0x6d5   :  { %1367 = vmatpush1.bf16.msra.mxu0 %v2523_v55  ;;  %1408 = vmatpush1.bf16.msra.mxu1 %v1978_v48 }
 0x6d6   :  { %1368 = vmatprep.subr.bf16.mxu0 %v2527_v56  ;;  %1409 = vmatprep.subr.bf16.mxu1 %v1979_v49 }
 0x6d9   :  { %1369 = vmatpush1.bf16.msra.mxu0 %v2531_v57  ;;  %1410 = vmatpush1.bf16.msra.mxu1 %v1980_v50 }
 0x6da   :  { %1712 = vmatprep.subr.bf16.mxu0 %v2075_v37 }
 0x77c   :  { %v1259_v51 = vpop.f32.mrf.mxu0  ;;  %v1300_v52 = vpop.f32.mrf.mxu1 }
 0x77d   :  { %v1311_v53 = vrot.slane %v1259_v51, 4  ;;  %v1313_v17 = vrot.slane %v1300_v52, 4 }
 0x77e   :  { %v1261_v54 = vpop.f32.mrf.mxu0  ;;  %v1302_v58 = vpop.f32.mrf.mxu1 }
 0x77f   :  { %v1319_v59 = vadd.f32 %v1311_v53, %v2280_v24  ;;  %v1312_v55 = vrot.slane %v1261_v54, 4  ;;  %v1314_v14 = vrot.slane %v1302_v58, 4  ;;  %v1321_v23 = vadd.f32 %v1313_v17, %v2289_v43 }
 0x780   :  { %v1263_v7 = vpop.f32.mrf.mxu0  ;;  %v1304_v60 = vpop.f32.mrf.mxu1 }
 0x781   :  { %v1685_v33 = vmul.f32 -1.442695, %v1319_v59  ;;  %v1320_v56 = vadd.f32 %v1312_v55, %v2282_v26  ;;  %v1322_v61 = vadd.f32 %v1314_v14, %v2292_v46 }
 0x782   :  { %v1264_v40 = vpop.f32.mrf.mxu0  ;;  %v1305_v41 = vpop.f32.mrf.mxu1 }
 0x783   :  { %1918 = vpow2.f32 %v1685_v33  ;;  %v1686_v57 = vmul.f32 -1.442695, %v1320_v56  ;;  %v1687_v18 = vmul.f32 -1.442695, %v1322_v61 }
 0x785   :  { %1920 = vpow2.f32 %v1686_v57 }
 0x786   :  { %1922 = vpow2.f32 %v1687_v18 }
 0x790   :  { %v1919_v21 = vpop.eup %1918 }
 0x791   :  { %v1326_v62 = vadd.f32 1.0, %v1919_v21  ;;  %v1691_v21 = vld [vmem:[%s2595_s5] ss:$0 sm:$0xff] }
 0x792   :  { %v1921_v11 = vpop.eup %1920 }
 0x793   :  { %1924 = vrcp.f32 %v1326_v62  ;;  %v1332_v47 = vadd.f32 1.0, %v1921_v11  ;;  %v1923_v28 = vpop.eup %1922 }
 0x794   :  { %1926 = vtanh.f32 %v1321_v23  ;;  %v1339_v44 = vadd.f32 1.0, %v1923_v28 }
 0x795   :  { %1928 = vrcp.f32 %v1332_v47 }
 0x796   :  { %1930 = vrcp.f32 %v1339_v44 }
 0x7a0   :  { %v1925_v29 = vpop.eup %1924 }
 0x7a1   :  { %v1927_v30 = vpop.eup %1926 }
 0x7a2   :  { %v1929_v32 = vpop.eup %1928  ;;  %v1346_v45 = vmul.f32 %v1927_v30, %v1925_v29 }
 0x7a3   :  { %v1345_v2 = vmul.f32 %v1929_v32, %v1343_v31  ;;  %v1931_v3 = vpop.eup %1930 }
 0x7a5   :  { %v2568_v9 = vadd.f32 %v1346_v45, %v1345_v2 }
 0x7a7   :  { %1932 = vtanh.f32 %v2568_v9  ;;  %v1472_v33 = vrot.slane %v2568_v9, 6 }
 0x7b4   :  { %v1933_v10 = vpop.eup %1932 }
 0x7b5   :  { %v1349_v15 = vmul.f32 %v1933_v10, %v1931_v3 }
 0x7b7   :  { %v1350_v8 = vpack.c.bf16 %v1349_v15, %v1349_v15 }
 0x7b9   :  { %v1352_v19 = vrot.slane %v1350_v8, 2 }
 0x7bb   :  { %1387 = vmatmul.mubr.bf16.vlgmr.msra.gmra.mxu0 %v1352_v19  ;;  %1428 = vmatmul.mubr.bf16.vlgmr.msra.gmra.mxu1 %v1352_v19 }
 0x7bc   :  { %1713 = vmatpush3.bf16.msra.mxu0 %v1814_v63  ;;  %1728 = vmatprep.mubr.msk.bf16.mxu0 %vm2076_vm4, %v2075_v37 }
 0x7bd   :  { %1714 = vmatprep.subr.bf16.mxu0 %v2075_v37 }
 0x7c0   :  { %1715 = vmatpush3.bf16.msra.mxu0 %v1815_v36 }
 0x7c1   :  { %1716 = vmatprep.subr.bf16.mxu0 %v2075_v37 }
 0x7c4   :  { %1717 = vmatpush3.bf16.msra.mxu0 %v1816_v42 }
 0x7c5   :  { %1718 = vmatprep.subr.bf16.mxu0 %v2075_v37 }
 0x7c8   :  { %1719 = vmatpush3.bf16.msra.mxu0 %v1817_v22 }
 0x7c9   :  { %1720 = vmatprep.subr.bf16.mxu0 %v2075_v37 }
 0x7cc   :  { %1721 = vmatpush3.bf16.msra.mxu0 %v1818_v35 }
 0x7cd   :  { %1722 = vmatprep.subr.bf16.mxu0 %v2075_v37 }
 0x7d0   :  { %1723 = vmatpush3.bf16.msra.mxu0 %v1819_v12 }
 0x7d1   :  { %1724 = vmatprep.subr.bf16.mxu0 %v2075_v37 }
 0x7d4   :  { %1725 = vmatpush3.bf16.msra.mxu0 %v1820_v25 }
 0x7d5   :  { %1726 = vmatprep.subr.bf16.mxu0 %v2075_v37 }
 0x7d8   :  { %1727 = vmatpush3.bf16.msra.mxu0 %v1821_v27 }
 0x87b   :  { %v1388_v13 = vpop.f32.mrf.mxu0  ;;  %v1429_v4 = vpop.f32.mrf.mxu1 }
 0x87c   :  { %v1440_v1 = vrot.slane %v1388_v13, 2  ;;  %v1442_v52 = vrot.slane %v1429_v4, 2 }
 0x87d   :  { %v1390_v34 = vpop.f32.mrf.mxu0  ;;  %v1431_v20 = vpop.f32.mrf.mxu1 }
 0x87e   :  { %v1448_v5 = vadd.f32 %v1440_v1, %v2280_v24  ;;  %v1441_v0 = vrot.slane %v1390_v34, 2  ;;  %v1443_v37 = vrot.slane %v1431_v20, 2  ;;  %v1450_v58 = vadd.f32 %v1442_v52, %v2289_v43 }
 0x87f   :  { %v1392_v39 = vpop.f32.mrf.mxu0  ;;  %v1433_v38 = vpop.f32.mrf.mxu1 }
 0x880   :  { %v1688_v16 = vmul.f32 -1.442695, %v1448_v5  ;;  %v1449_v6 = vadd.f32 %v1441_v0, %v2282_v26  ;;  %v1451_v51 = vadd.f32 %v1443_v37, %v2292_v46 }
 0x881   :  { %v1393_v48 = vpop.f32.mrf.mxu0  ;;  %v1434_v49 = vpop.f32.mrf.mxu1 }
 0x882   :  { %1934 = vpow2.f32 %v1688_v16  ;;  %v1689_v50 = vmul.f32 -1.442695, %v1449_v6  ;;  %v1690_v53 = vmul.f32 -1.442695, %v1451_v51 }
 0x884   :  { %1936 = vpow2.f32 %v1689_v50 }
 0x885   :  { %1938 = vpow2.f32 %v1690_v53 }
 0x88f   :  { %v1935_v54 = vpop.eup %1934 }
 0x890   :  { %v1455_v24 = vadd.f32 1.0, %v1935_v54 }
 0x891   :  { %v1937_v59 = vpop.eup %1936 }
 0x892   :  { %1940 = vrcp.f32 %v1455_v24  ;;  %v1461_v55 = vadd.f32 1.0, %v1937_v59  ;;  %v1939_v26 = vpop.eup %1938 }
 0x893   :  { %1942 = vtanh.f32 %v1450_v58  ;;  %v1468_v40 = vadd.f32 1.0, %v1939_v26 }
 0x894   :  { %1944 = vrcp.f32 %v1461_v55 }
 0x895   :  { %1946 = vrcp.f32 %v1468_v40 }
 0x89f   :  { %v1941_v7 = vpop.eup %1940 }
 0x8a0   :  { %v1943_v60 = vpop.eup %1942 }
 0x8a1   :  { %v1945_v56 = vpop.eup %1944  ;;  %v1475_v46 = vmul.f32 %v1943_v60, %v1941_v7 }
 0x8a2   :  { %v1474_v41 = vmul.f32 %v1945_v56, %v1472_v33  ;;  %v1947_v43 = vpop.eup %1946 }
 0x8a4   :  { %v1476_v57 = vadd.f32 %v1475_v46, %v1474_v41 }
 0x8a6   :  { %1948 = vtanh.f32 %v1476_v57 }
 0x8b3   :  { %v1949_v14 = vpop.eup %1948 }
 0x8b4   :  { %v1478_v61 = vmul.f32 %v1949_v14, %v1947_v43 }
 0x8b6   :  { %v1480_v17 = vrot.slane %v1478_v61, 6 }
 0x8b8   :  { %v1701_v18 = vpack.c.bf16 %v1480_v17, %v1480_v17 }
 0x8ba   :  { %1729 = vmatmul.mubr.msk.bf16.vlgmr.msra.gmra.mxu0 %vm1700_vm6, %v1701_v18 }
 0x97a   :  { %v1590_v23 = vpop.f32.mrf.mxu0 }
 0x97b   :  { %v1591_v62 = vadd.f32 %v1691_v21, %v1590_v23 }
 0x97c   :  { %v1730_v11 = vpop.f32.mrf.mxu0 }
 0x97d   :  { %1596 = vst [vmem:[#allocation8] sm:$0xff] %v1591_v62 }
 0x97e   :  { %v1593_v47 = vpop.f32.mrf.mxu0 }
 0x97f   :  { %2052 = shalt.err (!%p2049_p5)
}
 0x980   :  { %1606 = dma.vmem_to_hbm [thread:$0]  %s1604_s20, 128, %s2596_s6, [#allocation4]   ;;  %v1731_v28 = vpop.f32.mrf.mxu0 }
 0x981   :  { %2065 = dma.done.wait [#allocation4], 128  }
 0x982   :  { %2066 = vsyncadd [#allocation4], 4294967168 }
 0x983   :  { %1610 = vsyncpa [#allocation3], 1 }
 0x984   :  { %1611 = vsyncpa [#allocation6], 1 }
 0x985   :  { %1612 = vsyncpa [#allocation4], 1 }

</bundles_post_ra>
